<compile_context>
chip_gen: v7x
topology: tpu7x:2x2x1
jax: 0.10.0
libtpu: 0.0.40
codegen_flags: <defaults>
</compile_context>

<pallas_src>
import functools

import jax
import jax.numpy as jnp
from jax.experimental import pallas as pl
from jax.experimental.pallas import tpu as pltpu


def _sigmoid(x):
    # EUP-friendly sigmoid (tanh-based, no divides) — identical math to 1/(1+exp(-x)).
    return 0.5 * (jnp.tanh(0.5 * x) + 1.0)


def _decoder_kernel(x_ref, ctx_ref, wih_ref, whh_ref, b_ref,
                    wc_ref, bc_ref, wo_ref, bo_ref,
                    out_ref, xg_sc, h_all_sc,
                    *, seq_len, batch, hidden):
    Hp = hidden
    B = batch

    # (1) Batched input projection for ALL timesteps at once (single big MXU matmul):
    #     (T*B, I) @ (I, 4Hp) + b  ->  (T*B, 4Hp)
    xg_sc[...] = (jnp.dot(x_ref[...], wih_ref[...],
                          preferred_element_type=jnp.float32)
                  + b_ref[...])

    # (2) Initial recurrent state: h0 = context @ Wc^T + bc, c0 = 0.
    h0 = (jnp.dot(ctx_ref[...], wc_ref[...],
                  preferred_element_type=jnp.float32)
          + bc_ref[...])
    c0 = jnp.zeros((B, Hp), jnp.float32)

    def step(t, carry):
        h_prev, c_prev = carry
        row = pl.multiple_of(t * B, B)

        # Per-step gates: only the recurrent matmul remains inside the loop.
        g = (xg_sc[pl.ds(row, B), :]
             + jnp.dot(h_prev, whh_ref[...],
                       preferred_element_type=jnp.float32))

        # PyTorch gate order [i, f, g, o]; Hp is a multiple of 128 so every slice
        # is a lane-aligned block.
        i_g = _sigmoid(g[:, 0 * Hp:1 * Hp])
        f_g = _sigmoid(g[:, 1 * Hp:2 * Hp])
        g_g = jnp.tanh(g[:, 2 * Hp:3 * Hp])
        o_g = _sigmoid(g[:, 3 * Hp:4 * Hp])

        c_new = f_g * c_prev + i_g * g_g
        h_new = o_g * jnp.tanh(c_new)

        h_all_sc[pl.ds(row, B), :] = h_new
        return h_new, c_new

    jax.lax.fori_loop(0, seq_len, step, (h0, c0), unroll=(seq_len <= 16))

    # (3) Batched output projection over all timesteps; Op is a multiple of 128 so
    #     the store is lane-dense.
    out_ref[...] = (jnp.dot(h_all_sc[...], wo_ref[...],
                            preferred_element_type=jnp.float32)
                    + bo_ref[...]).astype(out_ref.dtype)


def _round_up(n, m):
    return (n + m - 1) // m * m


def decoder_forward(x, context, params):
    """x: (B, T, input_size), context: (B, cond_dim) -> (B, T, output_size)."""
    B, T, I = x.shape
    C = context.shape[-1]
    H = params["w_hh"].shape[1]
    O = params["w_out"].shape[0]

    Bp = _round_up(B, 8)
    Hp = _round_up(H, 128)
    Op = _round_up(O, 128)

    f32 = jnp.float32

    def pad_gate_cols(w_t):
        # (rows, 4H) -> (rows, 4*Hp): zero-pad each gate block to Hp lanes.
        rows = w_t.shape[0]
        w4 = w_t.reshape(rows, 4, H)
        w4 = jnp.pad(w4, ((0, 0), (0, 0), (0, Hp - H)))
        return w4.reshape(rows, 4 * Hp)

    # Kernel-ready (transposed + padded) parameters. Zero padding keeps padded
    # hidden units identically zero through the recurrence.
    w_ih_t = pad_gate_cols(params["w_ih"].astype(f32).T)                       # (I, 4Hp)
    w_hh_t = jnp.pad(params["w_hh"].astype(f32).T, ((0, Hp - H), (0, 0)))
    w_hh_t = pad_gate_cols(w_hh_t)                                             # (Hp, 4Hp)
    b_lstm = pad_gate_cols((params["b_ih"] + params["b_hh"])
                           .astype(f32).reshape(1, 4 * H))                     # (1, 4Hp)
    w_cond_t = jnp.pad(params["w_cond"].astype(f32).T, ((0, 0), (0, Hp - H)))  # (C, Hp)
    b_cond = jnp.pad(params["b_cond"].astype(f32).reshape(1, H),
                     ((0, 0), (0, Hp - H)))                                    # (1, Hp)
    w_out_t = jnp.pad(params["w_out"].astype(f32).T,
                      ((0, Hp - H), (0, Op - O)))                              # (Hp, Op)
    b_out = jnp.pad(params["b_out"].astype(f32).reshape(1, O),
                    ((0, 0), (0, Op - O)))                                     # (1, Op)

    # Time-major, batch-padded, flattened input: (T*Bp, I).
    x_tm = jnp.transpose(x.astype(f32), (1, 0, 2))            # (T, B, I)
    x_tm = jnp.pad(x_tm, ((0, 0), (0, Bp - B), (0, 0)))       # (T, Bp, I)
    x_flat = x_tm.reshape(T * Bp, I)
    ctx_p = jnp.pad(context.astype(f32), ((0, Bp - B), (0, 0)))  # (Bp, C)

    # Explicit VMEM budget (whole problem is resident; no grid, no double buffering).
    footprint = 4 * (T * Bp * I + Bp * C
                     + I * 4 * Hp + Hp * 4 * Hp + 4 * Hp
                     + C * Hp + Hp + Hp * Op + Op
                     + T * Bp * Op                 # output
                     + T * Bp * 4 * Hp             # xg scratch
                     + T * Bp * Hp)                # h_all scratch
    vmem_limit = min(max(2 * footprint, 32 * 1024 * 1024), 48 * 1024 * 1024)

    vmem_spec = pl.BlockSpec(memory_space=pltpu.MemorySpace.VMEM)

    out_flat = pl.pallas_call(
        functools.partial(_decoder_kernel, seq_len=T, batch=Bp, hidden=Hp),
        out_shape=jax.ShapeDtypeStruct((T * Bp, Op), jnp.float32),
        in_specs=[vmem_spec] * 9,
        out_specs=vmem_spec,
        scratch_shapes=[
            pltpu.VMEM((T * Bp, 4 * Hp), jnp.float32),  # per-step input-gate slab
            pltpu.VMEM((T * Bp, Hp), jnp.float32),      # all hidden states
        ],
        compiler_params=pltpu.CompilerParams(vmem_limit_bytes=vmem_limit),
    )(x_flat, ctx_p, w_ih_t, w_hh_t, b_lstm, w_cond_t, b_cond, w_out_t, b_out)

    out = out_flat.reshape(T, Bp, Op)[:, :B, :O]
    return jnp.transpose(out, (1, 0, 2))  # back to batch-first (B, T, O)


def make_params(key, input_size, hidden_size, output_size, cond_dim):
    """Deterministic synthetic parameters in PyTorch layout / init."""
    ks = jax.random.split(key, 8)
    s = 1.0 / jnp.sqrt(hidden_size)

    def u(k, shape, scale):
        return jax.random.uniform(k, shape, jnp.float32, -scale, scale)

    sc = 1.0 / jnp.sqrt(cond_dim)
    so = 1.0 / jnp.sqrt(hidden_size)
    return {
        "w_ih": u(ks[0], (4 * hidden_size, input_size), s),    # lstm.weight_ih_l0
        "w_hh": u(ks[1], (4 * hidden_size, hidden_size), s),   # lstm.weight_hh_l0
        "b_ih": u(ks[2], (4 * hidden_size,), s),
        "b_hh": u(ks[3], (4 * hidden_size,), s),
        "w_cond": u(ks[4], (hidden_size, cond_dim), sc),        # cond2hidden.weight
        "b_cond": u(ks[5], (hidden_size,), sc),
        "w_out": u(ks[6], (output_size, hidden_size), so),      # hid2act.weight
        "b_out": u(ks[7], (output_size,), so),
    }


def decoder_reference(x, context, params):
    """Pure-JAX reference (lax.scan LSTM, PyTorch semantics) for validation."""
    H = params["w_hh"].shape[1]
    h0 = context @ params["w_cond"].T + params["b_cond"]
    c0 = jnp.zeros_like(h0)
    w_ih_t = params["w_ih"].T
    w_hh_t = params["w_hh"].T
    b = params["b_ih"] + params["b_hh"]

    def step(carry, x_t):
        h, c = carry
        gates = x_t @ w_ih_t + h @ w_hh_t + b
        i = jax.nn.sigmoid(gates[:, 0 * H:1 * H])
        f = jax.nn.sigmoid(gates[:, 1 * H:2 * H])
        g = jnp.tanh(gates[:, 2 * H:3 * H])
        o = jax.nn.sigmoid(gates[:, 3 * H:4 * H])
        c_new = f * c + i * g
        h_new = o * jnp.tanh(c_new)
        return (h_new, c_new), h_new

    _, hs = jax.lax.scan(step, (h0, c0), jnp.transpose(x, (1, 0, 2)))
    y = hs @ params["w_out"].T + params["b_out"]       # (T, B, O)
    return jnp.transpose(y, (1, 0, 2))


if __name__ == "__main__":
    B, T = 2, 8
    input_size, hidden_size, output_size, cond_dim = 16, 32, 16, 32

    key = jax.random.PRNGKey(0)
    kx, kc, kp = jax.random.split(key, 3)
    x = jax.random.normal(kx, (B, T, input_size), jnp.float32)
    context = jax.random.normal(kc, (B, cond_dim), jnp.float32)
    params = make_params(kp, input_size, hidden_size, output_size, cond_dim)

    out = jax.jit(decoder_forward)(x, context, params)
    out = jax.block_until_ready(out)

    ref = decoder_reference(x, context, params)
    assert out.shape == (B, T, output_size)
    assert jnp.allclose(out, ref, atol=1e-4, rtol=1e-4), "mismatch vs reference"

    print("KERNEL_OK")
</pallas_src>

<mosaic_0001>
module attributes {stable_mosaic.version = 11 : i64} {
  func.func @_decoder_kernel(%arg0: memref<64x16xf32, #tpu.memory_space<vmem>>, %arg1: memref<8x32xf32, #tpu.memory_space<vmem>>, %arg2: memref<16x512xf32, #tpu.memory_space<vmem>>, %arg3: memref<128x512xf32, #tpu.memory_space<vmem>>, %arg4: memref<1x512xf32, #tpu.memory_space<vmem>>, %arg5: memref<32x128xf32, #tpu.memory_space<vmem>>, %arg6: memref<1x128xf32, #tpu.memory_space<vmem>>, %arg7: memref<128x128xf32, #tpu.memory_space<vmem>>, %arg8: memref<1x128xf32, #tpu.memory_space<vmem>>, %arg9: memref<64x128xf32, #tpu.memory_space<vmem>>, %arg10: memref<64x512xf32, #tpu.memory_space<vmem>>, %arg11: memref<64x128xf32, #tpu.memory_space<vmem>>) attributes {dimension_semantics = [], scalar_prefetch = 0 : i64, scratch_operands = 2 : i64, tpu.core_type = #tpu.core_type<tc>} {
    %c0 = arith.constant 0 : index
    %c0_0 = arith.constant 0 : index
    %0 = vector.load %arg0[%c0, %c0_0] : memref<64x16xf32, #tpu.memory_space<vmem>>, vector<64x16xf32>
    %c0_1 = arith.constant 0 : index
    %c0_2 = arith.constant 0 : index
    %1 = vector.load %arg2[%c0_1, %c0_2] : memref<16x512xf32, #tpu.memory_space<vmem>>, vector<16x512xf32>
    %cst = arith.constant dense<0.000000e+00> : vector<64x512xf32>
    %2 = tpu.matmul %0, %1, %cst {dimension_numbers = #tpu.dot_dimension_numbers<[1], [0], [0], [1], [0, 0, 1, 1], [], []>} : vector<64x16xf32>, vector<16x512xf32>, vector<64x512xf32> -> vector<64x512xf32>
    %c0_3 = arith.constant 0 : index
    %c0_4 = arith.constant 0 : index
    %3 = vector.load %arg4[%c0_3, %c0_4] : memref<1x512xf32, #tpu.memory_space<vmem>>, vector<1x512xf32>
    %4 = vector.broadcast %3 : vector<1x512xf32> to vector<64x512xf32>
    %5 = arith.addf %2, %4 : vector<64x512xf32>
    %c0_5 = arith.constant 0 : index
    %c0_6 = arith.constant 0 : index
    %6 = vector.load %arg10[%c0_5, %c0_6] : memref<64x512xf32, #tpu.memory_space<vmem>>, vector<64x512xf32>
    tpu.vector_store %arg10[%c0_5, %c0_6], %5 {strides = array<i32>} : memref<64x512xf32, #tpu.memory_space<vmem>>, vector<64x512xf32>,
    %c0_7 = arith.constant 0 : index
    %c0_8 = arith.constant 0 : index
    %7 = vector.load %arg1[%c0_7, %c0_8] : memref<8x32xf32, #tpu.memory_space<vmem>>, vector<8x32xf32>
    %c0_9 = arith.constant 0 : index
    %c0_10 = arith.constant 0 : index
    %8 = vector.load %arg5[%c0_9, %c0_10] : memref<32x128xf32, #tpu.memory_space<vmem>>, vector<32x128xf32>
    %cst_11 = arith.constant dense<0.000000e+00> : vector<8x128xf32>
    %9 = tpu.matmul %7, %8, %cst_11 {dimension_numbers = #tpu.dot_dimension_numbers<[1], [0], [0], [1], [0, 0, 1, 1], [], []>} : vector<8x32xf32>, vector<32x128xf32>, vector<8x128xf32> -> vector<8x128xf32>
    %c0_12 = arith.constant 0 : index
    %c0_13 = arith.constant 0 : index
    %10 = vector.load %arg6[%c0_12, %c0_13] : memref<1x128xf32, #tpu.memory_space<vmem>>, vector<1x128xf32>
    %11 = vector.broadcast %10 : vector<1x128xf32> to vector<8x128xf32>
    %12 = arith.addf %9, %11 : vector<8x128xf32>
    %cst_14 = arith.constant 0.000000e+00 : f32
    %13 = vector.broadcast %cst_14 : f32 to vector<8x128xf32>
    %c0_i32 = arith.constant 0 : i32
    %c8_i32 = arith.constant 8 : i32
    %14 = arith.muli %c0_i32, %c8_i32 : i32
    %15 = tpu.assume_multiple %14, 8 : i32
    %16 = arith.index_cast %15 : i32 to index
    %c0_15 = arith.constant 0 : index
    %17 = vector.load %arg10[%16, %c0_15] : memref<64x512xf32, #tpu.memory_space<vmem>>, vector<8x512xf32>
    %c0_16 = arith.constant 0 : index
    %c0_17 = arith.constant 0 : index
    %18 = vector.load %arg3[%c0_16, %c0_17] : memref<128x512xf32, #tpu.memory_space<vmem>>, vector<128x512xf32>
    %cst_18 = arith.constant dense<0.000000e+00> : vector<8x512xf32>
    %19 = tpu.matmul %12, %18, %cst_18 {dimension_numbers = #tpu.dot_dimension_numbers<[1], [0], [0], [1], [0, 0, 1, 1], [], []>} : vector<8x128xf32>, vector<128x512xf32>, vector<8x512xf32> -> vector<8x512xf32>
    %20 = arith.addf %17, %19 : vector<8x512xf32>
    %21 = vector.extract_strided_slice %20 {offsets = [0, 0], sizes = [8, 128], strides = [1, 1]} : vector<8x512xf32> to vector<8x128xf32>
    %cst_19 = arith.constant 5.000000e-01 : f32
    %22 = vector.broadcast %cst_19 : f32 to vector<8x128xf32>
    %23 = arith.mulf %22, %21 : vector<8x128xf32>
    %24 = math.tanh %23 : vector<8x128xf32>
    %cst_20 = arith.constant 1.000000e+00 : f32
    %25 = vector.broadcast %cst_20 : f32 to vector<8x128xf32>
    %26 = arith.addf %24, %25 : vector<8x128xf32>
    %cst_21 = arith.constant 5.000000e-01 : f32
    %27 = vector.broadcast %cst_21 : f32 to vector<8x128xf32>
    %28 = arith.mulf %27, %26 : vector<8x128xf32>
    %29 = vector.extract_strided_slice %20 {offsets = [0, 128], sizes = [8, 128], strides = [1, 1]} : vector<8x512xf32> to vector<8x128xf32>
    %cst_22 = arith.constant 5.000000e-01 : f32
    %30 = vector.broadcast %cst_22 : f32 to vector<8x128xf32>
    %31 = arith.mulf %30, %29 : vector<8x128xf32>
    %32 = math.tanh %31 : vector<8x128xf32>
    %cst_23 = arith.constant 1.000000e+00 : f32
    %33 = vector.broadcast %cst_23 : f32 to vector<8x128xf32>
    %34 = arith.addf %32, %33 : vector<8x128xf32>
    %cst_24 = arith.constant 5.000000e-01 : f32
    %35 = vector.broadcast %cst_24 : f32 to vector<8x128xf32>
    %36 = arith.mulf %35, %34 : vector<8x128xf32>
    %37 = vector.extract_strided_slice %20 {offsets = [0, 256], sizes = [8, 128], strides = [1, 1]} : vector<8x512xf32> to vector<8x128xf32>
    %38 = math.tanh %37 : vector<8x128xf32>
    %39 = vector.extract_strided_slice %20 {offsets = [0, 384], sizes = [8, 128], strides = [1, 1]} : vector<8x512xf32> to vector<8x128xf32>
    %cst_25 = arith.constant 5.000000e-01 : f32
    %40 = vector.broadcast %cst_25 : f32 to vector<8x128xf32>
    %41 = arith.mulf %40, %39 : vector<8x128xf32>
    %42 = math.tanh %41 : vector<8x128xf32>
    %cst_26 = arith.constant 1.000000e+00 : f32
    %43 = vector.broadcast %cst_26 : f32 to vector<8x128xf32>
    %44 = arith.addf %42, %43 : vector<8x128xf32>
    %cst_27 = arith.constant 5.000000e-01 : f32
    %45 = vector.broadcast %cst_27 : f32 to vector<8x128xf32>
    %46 = arith.mulf %45, %44 : vector<8x128xf32>
    %47 = arith.mulf %36, %13 : vector<8x128xf32>
    %48 = arith.mulf %28, %38 : vector<8x128xf32>
    %49 = arith.addf %47, %48 : vector<8x128xf32>
    %50 = math.tanh %49 : vector<8x128xf32>
    %51 = arith.mulf %46, %50 : vector<8x128xf32>
    %52 = arith.index_cast %15 : i32 to index
    %c0_28 = arith.constant 0 : index
    %53 = vector.load %arg11[%52, %c0_28] : memref<64x128xf32, #tpu.memory_space<vmem>>, vector<8x128xf32>
    tpu.vector_store %arg11[%52, %c0_28], %51 {strides = array<i32>} : memref<64x128xf32, #tpu.memory_space<vmem>>, vector<8x128xf32>,
    %c1_i32 = arith.constant 1 : i32
    %c8_i32_29 = arith.constant 8 : i32
    %54 = arith.muli %c1_i32, %c8_i32_29 : i32
    %55 = tpu.assume_multiple %54, 8 : i32
    %56 = arith.index_cast %55 : i32 to index
    %c0_30 = arith.constant 0 : index
    %57 = vector.load %arg10[%56, %c0_30] : memref<64x512xf32, #tpu.memory_space<vmem>>, vector<8x512xf32>
    %c0_31 = arith.constant 0 : index
    %c0_32 = arith.constant 0 : index
    %58 = vector.load %arg3[%c0_31, %c0_32] : memref<128x512xf32, #tpu.memory_space<vmem>>, vector<128x512xf32>
    %cst_33 = arith.constant dense<0.000000e+00> : vector<8x512xf32>
    %59 = tpu.matmul %51, %58, %cst_33 {dimension_numbers = #tpu.dot_dimension_numbers<[1], [0], [0], [1], [0, 0, 1, 1], [], []>} : vector<8x128xf32>, vector<128x512xf32>, vector<8x512xf32> -> vector<8x512xf32>
    %60 = arith.addf %57, %59 : vector<8x512xf32>
    %61 = vector.extract_strided_slice %60 {offsets = [0, 0], sizes = [8, 128], strides = [1, 1]} : vector<8x512xf32> to vector<8x128xf32>
    %cst_34 = arith.constant 5.000000e-01 : f32
    %62 = vector.broadcast %cst_34 : f32 to vector<8x128xf32>
    %63 = arith.mulf %62, %61 : vector<8x128xf32>
    %64 = math.tanh %63 : vector<8x128xf32>
    %cst_35 = arith.constant 1.000000e+00 : f32
    %65 = vector.broadcast %cst_35 : f32 to vector<8x128xf32>
    %66 = arith.addf %64, %65 : vector<8x128xf32>
    %cst_36 = arith.constant 5.000000e-01 : f32
    %67 = vector.broadcast %cst_36 : f32 to vector<8x128xf32>
    %68 = arith.mulf %67, %66 : vector<8x128xf32>
    %69 = vector.extract_strided_slice %60 {offsets = [0, 128], sizes = [8, 128], strides = [1, 1]} : vector<8x512xf32> to vector<8x128xf32>
    %cst_37 = arith.constant 5.000000e-01 : f32
    %70 = vector.broadcast %cst_37 : f32 to vector<8x128xf32>
    %71 = arith.mulf %70, %69 : vector<8x128xf32>
    %72 = math.tanh %71 : vector<8x128xf32>
    %cst_38 = arith.constant 1.000000e+00 : f32
    %73 = vector.broadcast %cst_38 : f32 to vector<8x128xf32>
    %74 = arith.addf %72, %73 : vector<8x128xf32>
    %cst_39 = arith.constant 5.000000e-01 : f32
    %75 = vector.broadcast %cst_39 : f32 to vector<8x128xf32>
    %76 = arith.mulf %75, %74 : vector<8x128xf32>
    %77 = vector.extract_strided_slice %60 {offsets = [0, 256], sizes = [8, 128], strides = [1, 1]} : vector<8x512xf32> to vector<8x128xf32>
    %78 = math.tanh %77 : vector<8x128xf32>
    %79 = vector.extract_strided_slice %60 {offsets = [0, 384], sizes = [8, 128], strides = [1, 1]} : vector<8x512xf32> to vector<8x128xf32>
    %cst_40 = arith.constant 5.000000e-01 : f32
    %80 = vector.broadcast %cst_40 : f32 to vector<8x128xf32>
    %81 = arith.mulf %80, %79 : vector<8x128xf32>
    %82 = math.tanh %81 : vector<8x128xf32>
    %cst_41 = arith.constant 1.000000e+00 : f32
    %83 = vector.broadcast %cst_41 : f32 to vector<8x128xf32>
    %84 = arith.addf %82, %83 : vector<8x128xf32>
    %cst_42 = arith.constant 5.000000e-01 : f32
    %85 = vector.broadcast %cst_42 : f32 to vector<8x128xf32>
    %86 = arith.mulf %85, %84 : vector<8x128xf32>
    %87 = arith.mulf %76, %49 : vector<8x128xf32>
    %88 = arith.mulf %68, %78 : vector<8x128xf32>
    %89 = arith.addf %87, %88 : vector<8x128xf32>
    %90 = math.tanh %89 : vector<8x128xf32>
    %91 = arith.mulf %86, %90 : vector<8x128xf32>
    %92 = arith.index_cast %55 : i32 to index
    %c0_43 = arith.constant 0 : index
    %93 = vector.load %arg11[%92, %c0_43] : memref<64x128xf32, #tpu.memory_space<vmem>>, vector<8x128xf32>
    tpu.vector_store %arg11[%92, %c0_43], %91 {strides = array<i32>} : memref<64x128xf32, #tpu.memory_space<vmem>>, vector<8x128xf32>,
    %c2_i32 = arith.constant 2 : i32
    %c8_i32_44 = arith.constant 8 : i32
    %94 = arith.muli %c2_i32, %c8_i32_44 : i32
    %95 = tpu.assume_multiple %94, 8 : i32
    %96 = arith.index_cast %95 : i32 to index
    %c0_45 = arith.constant 0 : index
    %97 = vector.load %arg10[%96, %c0_45] : memref<64x512xf32, #tpu.memory_space<vmem>>, vector<8x512xf32>
    %c0_46 = arith.constant 0 : index
    %c0_47 = arith.constant 0 : index
    %98 = vector.load %arg3[%c0_46, %c0_47] : memref<128x512xf32, #tpu.memory_space<vmem>>, vector<128x512xf32>
    %cst_48 = arith.constant dense<0.000000e+00> : vector<8x512xf32>
    %99 = tpu.matmul %91, %98, %cst_48 {dimension_numbers = #tpu.dot_dimension_numbers<[1], [0], [0], [1], [0, 0, 1, 1], [], []>} : vector<8x128xf32>, vector<128x512xf32>, vector<8x512xf32> -> vector<8x512xf32>
    %100 = arith.addf %97, %99 : vector<8x512xf32>
    %101 = vector.extract_strided_slice %100 {offsets = [0, 0], sizes = [8, 128], strides = [1, 1]} : vector<8x512xf32> to vector<8x128xf32>
    %cst_49 = arith.constant 5.000000e-01 : f32
    %102 = vector.broadcast %cst_49 : f32 to vector<8x128xf32>
    %103 = arith.mulf %102, %101 : vector<8x128xf32>
    %104 = math.tanh %103 : vector<8x128xf32>
    %cst_50 = arith.constant 1.000000e+00 : f32
    %105 = vector.broadcast %cst_50 : f32 to vector<8x128xf32>
    %106 = arith.addf %104, %105 : vector<8x128xf32>
    %cst_51 = arith.constant 5.000000e-01 : f32
    %107 = vector.broadcast %cst_51 : f32 to vector<8x128xf32>
    %108 = arith.mulf %107, %106 : vector<8x128xf32>
    %109 = vector.extract_strided_slice %100 {offsets = [0, 128], sizes = [8, 128], strides = [1, 1]} : vector<8x512xf32> to vector<8x128xf32>
    %cst_52 = arith.constant 5.000000e-01 : f32
    %110 = vector.broadcast %cst_52 : f32 to vector<8x128xf32>
    %111 = arith.mulf %110, %109 : vector<8x128xf32>
    %112 = math.tanh %111 : vector<8x128xf32>
    %cst_53 = arith.constant 1.000000e+00 : f32
    %113 = vector.broadcast %cst_53 : f32 to vector<8x128xf32>
    %114 = arith.addf %112, %113 : vector<8x128xf32>
    %cst_54 = arith.constant 5.000000e-01 : f32
    %115 = vector.broadcast %cst_54 : f32 to vector<8x128xf32>
    %116 = arith.mulf %115, %114 : vector<8x128xf32>
    %117 = vector.extract_strided_slice %100 {offsets = [0, 256], sizes = [8, 128], strides = [1, 1]} : vector<8x512xf32> to vector<8x128xf32>
    %118 = math.tanh %117 : vector<8x128xf32>
    %119 = vector.extract_strided_slice %100 {offsets = [0, 384], sizes = [8, 128], strides = [1, 1]} : vector<8x512xf32> to vector<8x128xf32>
    %cst_55 = arith.constant 5.000000e-01 : f32
    %120 = vector.broadcast %cst_55 : f32 to vector<8x128xf32>
    %121 = arith.mulf %120, %119 : vector<8x128xf32>
    %122 = math.tanh %121 : vector<8x128xf32>
    %cst_56 = arith.constant 1.000000e+00 : f32
    %123 = vector.broadcast %cst_56 : f32 to vector<8x128xf32>
    %124 = arith.addf %122, %123 : vector<8x128xf32>
    %cst_57 = arith.constant 5.000000e-01 : f32
    %125 = vector.broadcast %cst_57 : f32 to vector<8x128xf32>
    %126 = arith.mulf %125, %124 : vector<8x128xf32>
    %127 = arith.mulf %116, %89 : vector<8x128xf32>
    %128 = arith.mulf %108, %118 : vector<8x128xf32>
    %129 = arith.addf %127, %128 : vector<8x128xf32>
    %130 = math.tanh %129 : vector<8x128xf32>
    %131 = arith.mulf %126, %130 : vector<8x128xf32>
    %132 = arith.index_cast %95 : i32 to index
    %c0_58 = arith.constant 0 : index
    %133 = vector.load %arg11[%132, %c0_58] : memref<64x128xf32, #tpu.memory_space<vmem>>, vector<8x128xf32>
    tpu.vector_store %arg11[%132, %c0_58], %131 {strides = array<i32>} : memref<64x128xf32, #tpu.memory_space<vmem>>, vector<8x128xf32>,
    %c3_i32 = arith.constant 3 : i32
    %c8_i32_59 = arith.constant 8 : i32
    %134 = arith.muli %c3_i32, %c8_i32_59 : i32
    %135 = tpu.assume_multiple %134, 8 : i32
    %136 = arith.index_cast %135 : i32 to index
    %c0_60 = arith.constant 0 : index
    %137 = vector.load %arg10[%136, %c0_60] : memref<64x512xf32, #tpu.memory_space<vmem>>, vector<8x512xf32>
    %c0_61 = arith.constant 0 : index
    %c0_62 = arith.constant 0 : index
    %138 = vector.load %arg3[%c0_61, %c0_62] : memref<128x512xf32, #tpu.memory_space<vmem>>, vector<128x512xf32>
    %cst_63 = arith.constant dense<0.000000e+00> : vector<8x512xf32>
    %139 = tpu.matmul %131, %138, %cst_63 {dimension_numbers = #tpu.dot_dimension_numbers<[1], [0], [0], [1], [0, 0, 1, 1], [], []>} : vector<8x128xf32>, vector<128x512xf32>, vector<8x512xf32> -> vector<8x512xf32>
    %140 = arith.addf %137, %139 : vector<8x512xf32>
    %141 = vector.extract_strided_slice %140 {offsets = [0, 0], sizes = [8, 128], strides = [1, 1]} : vector<8x512xf32> to vector<8x128xf32>
    %cst_64 = arith.constant 5.000000e-01 : f32
    %142 = vector.broadcast %cst_64 : f32 to vector<8x128xf32>
    %143 = arith.mulf %142, %141 : vector<8x128xf32>
    %144 = math.tanh %143 : vector<8x128xf32>
    %cst_65 = arith.constant 1.000000e+00 : f32
    %145 = vector.broadcast %cst_65 : f32 to vector<8x128xf32>
    %146 = arith.addf %144, %145 : vector<8x128xf32>
    %cst_66 = arith.constant 5.000000e-01 : f32
    %147 = vector.broadcast %cst_66 : f32 to vector<8x128xf32>
    %148 = arith.mulf %147, %146 : vector<8x128xf32>
    %149 = vector.extract_strided_slice %140 {offsets = [0, 128], sizes = [8, 128], strides = [1, 1]} : vector<8x512xf32> to vector<8x128xf32>
    %cst_67 = arith.constant 5.000000e-01 : f32
    %150 = vector.broadcast %cst_67 : f32 to vector<8x128xf32>
    %151 = arith.mulf %150, %149 : vector<8x128xf32>
    %152 = math.tanh %151 : vector<8x128xf32>
    %cst_68 = arith.constant 1.000000e+00 : f32
    %153 = vector.broadcast %cst_68 : f32 to vector<8x128xf32>
    %154 = arith.addf %152, %153 : vector<8x128xf32>
    %cst_69 = arith.constant 5.000000e-01 : f32
    %155 = vector.broadcast %cst_69 : f32 to vector<8x128xf32>
    %156 = arith.mulf %155, %154 : vector<8x128xf32>
    %157 = vector.extract_strided_slice %140 {offsets = [0, 256], sizes = [8, 128], strides = [1, 1]} : vector<8x512xf32> to vector<8x128xf32>
    %158 = math.tanh %157 : vector<8x128xf32>
    %159 = vector.extract_strided_slice %140 {offsets = [0, 384], sizes = [8, 128], strides = [1, 1]} : vector<8x512xf32> to vector<8x128xf32>
    %cst_70 = arith.constant 5.000000e-01 : f32
    %160 = vector.broadcast %cst_70 : f32 to vector<8x128xf32>
    %161 = arith.mulf %160, %159 : vector<8x128xf32>
    %162 = math.tanh %161 : vector<8x128xf32>
    %cst_71 = arith.constant 1.000000e+00 : f32
    %163 = vector.broadcast %cst_71 : f32 to vector<8x128xf32>
    %164 = arith.addf %162, %163 : vector<8x128xf32>
    %cst_72 = arith.constant 5.000000e-01 : f32
    %165 = vector.broadcast %cst_72 : f32 to vector<8x128xf32>
    %166 = arith.mulf %165, %164 : vector<8x128xf32>
    %167 = arith.mulf %156, %129 : vector<8x128xf32>
    %168 = arith.mulf %148, %158 : vector<8x128xf32>
    %169 = arith.addf %167, %168 : vector<8x128xf32>
    %170 = math.tanh %169 : vector<8x128xf32>
    %171 = arith.mulf %166, %170 : vector<8x128xf32>
    %172 = arith.index_cast %135 : i32 to index
    %c0_73 = arith.constant 0 : index
    %173 = vector.load %arg11[%172, %c0_73] : memref<64x128xf32, #tpu.memory_space<vmem>>, vector<8x128xf32>
    tpu.vector_store %arg11[%172, %c0_73], %171 {strides = array<i32>} : memref<64x128xf32, #tpu.memory_space<vmem>>, vector<8x128xf32>,
    %c4_i32 = arith.constant 4 : i32
    %c8_i32_74 = arith.constant 8 : i32
    %174 = arith.muli %c4_i32, %c8_i32_74 : i32
    %175 = tpu.assume_multiple %174, 8 : i32
    %176 = arith.index_cast %175 : i32 to index
    %c0_75 = arith.constant 0 : index
    %177 = vector.load %arg10[%176, %c0_75] : memref<64x512xf32, #tpu.memory_space<vmem>>, vector<8x512xf32>
    %c0_76 = arith.constant 0 : index
    %c0_77 = arith.constant 0 : index
    %178 = vector.load %arg3[%c0_76, %c0_77] : memref<128x512xf32, #tpu.memory_space<vmem>>, vector<128x512xf32>
    %cst_78 = arith.constant dense<0.000000e+00> : vector<8x512xf32>
    %179 = tpu.matmul %171, %178, %cst_78 {dimension_numbers = #tpu.dot_dimension_numbers<[1], [0], [0], [1], [0, 0, 1, 1], [], []>} : vector<8x128xf32>, vector<128x512xf32>, vector<8x512xf32> -> vector<8x512xf32>
    %180 = arith.addf %177, %179 : vector<8x512xf32>
    %181 = vector.extract_strided_slice %180 {offsets = [0, 0], sizes = [8, 128], strides = [1, 1]} : vector<8x512xf32> to vector<8x128xf32>
    %cst_79 = arith.constant 5.000000e-01 : f32
    %182 = vector.broadcast %cst_79 : f32 to vector<8x128xf32>
    %183 = arith.mulf %182, %181 : vector<8x128xf32>
    %184 = math.tanh %183 : vector<8x128xf32>
    %cst_80 = arith.constant 1.000000e+00 : f32
    %185 = vector.broadcast %cst_80 : f32 to vector<8x128xf32>
    %186 = arith.addf %184, %185 : vector<8x128xf32>
    %cst_81 = arith.constant 5.000000e-01 : f32
    %187 = vector.broadcast %cst_81 : f32 to vector<8x128xf32>
    %188 = arith.mulf %187, %186 : vector<8x128xf32>
    %189 = vector.extract_strided_slice %180 {offsets = [0, 128], sizes = [8, 128], strides = [1, 1]} : vector<8x512xf32> to vector<8x128xf32>
    %cst_82 = arith.constant 5.000000e-01 : f32
    %190 = vector.broadcast %cst_82 : f32 to vector<8x128xf32>
    %191 = arith.mulf %190, %189 : vector<8x128xf32>
    %192 = math.tanh %191 : vector<8x128xf32>
    %cst_83 = arith.constant 1.000000e+00 : f32
    %193 = vector.broadcast %cst_83 : f32 to vector<8x128xf32>
    %194 = arith.addf %192, %193 : vector<8x128xf32>
    %cst_84 = arith.constant 5.000000e-01 : f32
    %195 = vector.broadcast %cst_84 : f32 to vector<8x128xf32>
    %196 = arith.mulf %195, %194 : vector<8x128xf32>
    %197 = vector.extract_strided_slice %180 {offsets = [0, 256], sizes = [8, 128], strides = [1, 1]} : vector<8x512xf32> to vector<8x128xf32>
    %198 = math.tanh %197 : vector<8x128xf32>
    %199 = vector.extract_strided_slice %180 {offsets = [0, 384], sizes = [8, 128], strides = [1, 1]} : vector<8x512xf32> to vector<8x128xf32>
    %cst_85 = arith.constant 5.000000e-01 : f32
    %200 = vector.broadcast %cst_85 : f32 to vector<8x128xf32>
    %201 = arith.mulf %200, %199 : vector<8x128xf32>
    %202 = math.tanh %201 : vector<8x128xf32>
    %cst_86 = arith.constant 1.000000e+00 : f32
    %203 = vector.broadcast %cst_86 : f32 to vector<8x128xf32>
    %204 = arith.addf %202, %203 : vector<8x128xf32>
    %cst_87 = arith.constant 5.000000e-01 : f32
    %205 = vector.broadcast %cst_87 : f32 to vector<8x128xf32>
    %206 = arith.mulf %205, %204 : vector<8x128xf32>
    %207 = arith.mulf %196, %169 : vector<8x128xf32>
    %208 = arith.mulf %188, %198 : vector<8x128xf32>
    %209 = arith.addf %207, %208 : vector<8x128xf32>
    %210 = math.tanh %209 : vector<8x128xf32>
    %211 = arith.mulf %206, %210 : vector<8x128xf32>
    %212 = arith.index_cast %175 : i32 to index
    %c0_88 = arith.constant 0 : index
    %213 = vector.load %arg11[%212, %c0_88] : memref<64x128xf32, #tpu.memory_space<vmem>>, vector<8x128xf32>
    tpu.vector_store %arg11[%212, %c0_88], %211 {strides = array<i32>} : memref<64x128xf32, #tpu.memory_space<vmem>>, vector<8x128xf32>,
    %c5_i32 = arith.constant 5 : i32
    %c8_i32_89 = arith.constant 8 : i32
    %214 = arith.muli %c5_i32, %c8_i32_89 : i32
    %215 = tpu.assume_multiple %214, 8 : i32
    %216 = arith.index_cast %215 : i32 to index
    %c0_90 = arith.constant 0 : index
    %217 = vector.load %arg10[%216, %c0_90] : memref<64x512xf32, #tpu.memory_space<vmem>>, vector<8x512xf32>
    %c0_91 = arith.constant 0 : index
    %c0_92 = arith.constant 0 : index
    %218 = vector.load %arg3[%c0_91, %c0_92] : memref<128x512xf32, #tpu.memory_space<vmem>>, vector<128x512xf32>
    %cst_93 = arith.constant dense<0.000000e+00> : vector<8x512xf32>
    %219 = tpu.matmul %211, %218, %cst_93 {dimension_numbers = #tpu.dot_dimension_numbers<[1], [0], [0], [1], [0, 0, 1, 1], [], []>} : vector<8x128xf32>, vector<128x512xf32>, vector<8x512xf32> -> vector<8x512xf32>
    %220 = arith.addf %217, %219 : vector<8x512xf32>
    %221 = vector.extract_strided_slice %220 {offsets = [0, 0], sizes = [8, 128], strides = [1, 1]} : vector<8x512xf32> to vector<8x128xf32>
    %cst_94 = arith.constant 5.000000e-01 : f32
    %222 = vector.broadcast %cst_94 : f32 to vector<8x128xf32>
    %223 = arith.mulf %222, %221 : vector<8x128xf32>
    %224 = math.tanh %223 : vector<8x128xf32>
    %cst_95 = arith.constant 1.000000e+00 : f32
    %225 = vector.broadcast %cst_95 : f32 to vector<8x128xf32>
    %226 = arith.addf %224, %225 : vector<8x128xf32>
    %cst_96 = arith.constant 5.000000e-01 : f32
    %227 = vector.broadcast %cst_96 : f32 to vector<8x128xf32>
    %228 = arith.mulf %227, %226 : vector<8x128xf32>
    %229 = vector.extract_strided_slice %220 {offsets = [0, 128], sizes = [8, 128], strides = [1, 1]} : vector<8x512xf32> to vector<8x128xf32>
    %cst_97 = arith.constant 5.000000e-01 : f32
    %230 = vector.broadcast %cst_97 : f32 to vector<8x128xf32>
    %231 = arith.mulf %230, %229 : vector<8x128xf32>
    %232 = math.tanh %231 : vector<8x128xf32>
    %cst_98 = arith.constant 1.000000e+00 : f32
    %233 = vector.broadcast %cst_98 : f32 to vector<8x128xf32>
    %234 = arith.addf %232, %233 : vector<8x128xf32>
    %cst_99 = arith.constant 5.000000e-01 : f32
    %235 = vector.broadcast %cst_99 : f32 to vector<8x128xf32>
    %236 = arith.mulf %235, %234 : vector<8x128xf32>
    %237 = vector.extract_strided_slice %220 {offsets = [0, 256], sizes = [8, 128], strides = [1, 1]} : vector<8x512xf32> to vector<8x128xf32>
    %238 = math.tanh %237 : vector<8x128xf32>
    %239 = vector.extract_strided_slice %220 {offsets = [0, 384], sizes = [8, 128], strides = [1, 1]} : vector<8x512xf32> to vector<8x128xf32>
    %cst_100 = arith.constant 5.000000e-01 : f32
    %240 = vector.broadcast %cst_100 : f32 to vector<8x128xf32>
    %241 = arith.mulf %240, %239 : vector<8x128xf32>
    %242 = math.tanh %241 : vector<8x128xf32>
    %cst_101 = arith.constant 1.000000e+00 : f32
    %243 = vector.broadcast %cst_101 : f32 to vector<8x128xf32>
    %244 = arith.addf %242, %243 : vector<8x128xf32>
    %cst_102 = arith.constant 5.000000e-01 : f32
    %245 = vector.broadcast %cst_102 : f32 to vector<8x128xf32>
    %246 = arith.mulf %245, %244 : vector<8x128xf32>
    %247 = arith.mulf %236, %209 : vector<8x128xf32>
    %248 = arith.mulf %228, %238 : vector<8x128xf32>
    %249 = arith.addf %247, %248 : vector<8x128xf32>
    %250 = math.tanh %249 : vector<8x128xf32>
    %251 = arith.mulf %246, %250 : vector<8x128xf32>
    %252 = arith.index_cast %215 : i32 to index
    %c0_103 = arith.constant 0 : index
    %253 = vector.load %arg11[%252, %c0_103] : memref<64x128xf32, #tpu.memory_space<vmem>>, vector<8x128xf32>
    tpu.vector_store %arg11[%252, %c0_103], %251 {strides = array<i32>} : memref<64x128xf32, #tpu.memory_space<vmem>>, vector<8x128xf32>,
    %c6_i32 = arith.constant 6 : i32
    %c8_i32_104 = arith.constant 8 : i32
    %254 = arith.muli %c6_i32, %c8_i32_104 : i32
    %255 = tpu.assume_multiple %254, 8 : i32
    %256 = arith.index_cast %255 : i32 to index
    %c0_105 = arith.constant 0 : index
    %257 = vector.load %arg10[%256, %c0_105] : memref<64x512xf32, #tpu.memory_space<vmem>>, vector<8x512xf32>
    %c0_106 = arith.constant 0 : index
    %c0_107 = arith.constant 0 : index
    %258 = vector.load %arg3[%c0_106, %c0_107] : memref<128x512xf32, #tpu.memory_space<vmem>>, vector<128x512xf32>
    %cst_108 = arith.constant dense<0.000000e+00> : vector<8x512xf32>
    %259 = tpu.matmul %251, %258, %cst_108 {dimension_numbers = #tpu.dot_dimension_numbers<[1], [0], [0], [1], [0, 0, 1, 1], [], []>} : vector<8x128xf32>, vector<128x512xf32>, vector<8x512xf32> -> vector<8x512xf32>
    %260 = arith.addf %257, %259 : vector<8x512xf32>
    %261 = vector.extract_strided_slice %260 {offsets = [0, 0], sizes = [8, 128], strides = [1, 1]} : vector<8x512xf32> to vector<8x128xf32>
    %cst_109 = arith.constant 5.000000e-01 : f32
    %262 = vector.broadcast %cst_109 : f32 to vector<8x128xf32>
    %263 = arith.mulf %262, %261 : vector<8x128xf32>
    %264 = math.tanh %263 : vector<8x128xf32>
    %cst_110 = arith.constant 1.000000e+00 : f32
    %265 = vector.broadcast %cst_110 : f32 to vector<8x128xf32>
    %266 = arith.addf %264, %265 : vector<8x128xf32>
    %cst_111 = arith.constant 5.000000e-01 : f32
    %267 = vector.broadcast %cst_111 : f32 to vector<8x128xf32>
    %268 = arith.mulf %267, %266 : vector<8x128xf32>
    %269 = vector.extract_strided_slice %260 {offsets = [0, 128], sizes = [8, 128], strides = [1, 1]} : vector<8x512xf32> to vector<8x128xf32>
    %cst_112 = arith.constant 5.000000e-01 : f32
    %270 = vector.broadcast %cst_112 : f32 to vector<8x128xf32>
    %271 = arith.mulf %270, %269 : vector<8x128xf32>
    %272 = math.tanh %271 : vector<8x128xf32>
    %cst_113 = arith.constant 1.000000e+00 : f32
    %273 = vector.broadcast %cst_113 : f32 to vector<8x128xf32>
    %274 = arith.addf %272, %273 : vector<8x128xf32>
    %cst_114 = arith.constant 5.000000e-01 : f32
    %275 = vector.broadcast %cst_114 : f32 to vector<8x128xf32>
    %276 = arith.mulf %275, %274 : vector<8x128xf32>
    %277 = vector.extract_strided_slice %260 {offsets = [0, 256], sizes = [8, 128], strides = [1, 1]} : vector<8x512xf32> to vector<8x128xf32>
    %278 = math.tanh %277 : vector<8x128xf32>
    %279 = vector.extract_strided_slice %260 {offsets = [0, 384], sizes = [8, 128], strides = [1, 1]} : vector<8x512xf32> to vector<8x128xf32>
    %cst_115 = arith.constant 5.000000e-01 : f32
    %280 = vector.broadcast %cst_115 : f32 to vector<8x128xf32>
    %281 = arith.mulf %280, %279 : vector<8x128xf32>
    %282 = math.tanh %281 : vector<8x128xf32>
    %cst_116 = arith.constant 1.000000e+00 : f32
    %283 = vector.broadcast %cst_116 : f32 to vector<8x128xf32>
    %284 = arith.addf %282, %283 : vector<8x128xf32>
    %cst_117 = arith.constant 5.000000e-01 : f32
    %285 = vector.broadcast %cst_117 : f32 to vector<8x128xf32>
    %286 = arith.mulf %285, %284 : vector<8x128xf32>
    %287 = arith.mulf %276, %249 : vector<8x128xf32>
    %288 = arith.mulf %268, %278 : vector<8x128xf32>
    %289 = arith.addf %287, %288 : vector<8x128xf32>
    %290 = math.tanh %289 : vector<8x128xf32>
    %291 = arith.mulf %286, %290 : vector<8x128xf32>
    %292 = arith.index_cast %255 : i32 to index
    %c0_118 = arith.constant 0 : index
    %293 = vector.load %arg11[%292, %c0_118] : memref<64x128xf32, #tpu.memory_space<vmem>>, vector<8x128xf32>
    tpu.vector_store %arg11[%292, %c0_118], %291 {strides = array<i32>} : memref<64x128xf32, #tpu.memory_space<vmem>>, vector<8x128xf32>,
    %c7_i32 = arith.constant 7 : i32
    %c8_i32_119 = arith.constant 8 : i32
    %294 = arith.muli %c7_i32, %c8_i32_119 : i32
    %295 = tpu.assume_multiple %294, 8 : i32
    %296 = arith.index_cast %295 : i32 to index
    %c0_120 = arith.constant 0 : index
    %297 = vector.load %arg10[%296, %c0_120] : memref<64x512xf32, #tpu.memory_space<vmem>>, vector<8x512xf32>
    %c0_121 = arith.constant 0 : index
    %c0_122 = arith.constant 0 : index
    %298 = vector.load %arg3[%c0_121, %c0_122] : memref<128x512xf32, #tpu.memory_space<vmem>>, vector<128x512xf32>
    %cst_123 = arith.constant dense<0.000000e+00> : vector<8x512xf32>
    %299 = tpu.matmul %291, %298, %cst_123 {dimension_numbers = #tpu.dot_dimension_numbers<[1], [0], [0], [1], [0, 0, 1, 1], [], []>} : vector<8x128xf32>, vector<128x512xf32>, vector<8x512xf32> -> vector<8x512xf32>
    %300 = arith.addf %297, %299 : vector<8x512xf32>
    %301 = vector.extract_strided_slice %300 {offsets = [0, 0], sizes = [8, 128], strides = [1, 1]} : vector<8x512xf32> to vector<8x128xf32>
    %cst_124 = arith.constant 5.000000e-01 : f32
    %302 = vector.broadcast %cst_124 : f32 to vector<8x128xf32>
    %303 = arith.mulf %302, %301 : vector<8x128xf32>
    %304 = math.tanh %303 : vector<8x128xf32>
    %cst_125 = arith.constant 1.000000e+00 : f32
    %305 = vector.broadcast %cst_125 : f32 to vector<8x128xf32>
    %306 = arith.addf %304, %305 : vector<8x128xf32>
    %cst_126 = arith.constant 5.000000e-01 : f32
    %307 = vector.broadcast %cst_126 : f32 to vector<8x128xf32>
    %308 = arith.mulf %307, %306 : vector<8x128xf32>
    %309 = vector.extract_strided_slice %300 {offsets = [0, 128], sizes = [8, 128], strides = [1, 1]} : vector<8x512xf32> to vector<8x128xf32>
    %cst_127 = arith.constant 5.000000e-01 : f32
    %310 = vector.broadcast %cst_127 : f32 to vector<8x128xf32>
    %311 = arith.mulf %310, %309 : vector<8x128xf32>
    %312 = math.tanh %311 : vector<8x128xf32>
    %cst_128 = arith.constant 1.000000e+00 : f32
    %313 = vector.broadcast %cst_128 : f32 to vector<8x128xf32>
    %314 = arith.addf %312, %313 : vector<8x128xf32>
    %cst_129 = arith.constant 5.000000e-01 : f32
    %315 = vector.broadcast %cst_129 : f32 to vector<8x128xf32>
    %316 = arith.mulf %315, %314 : vector<8x128xf32>
    %317 = vector.extract_strided_slice %300 {offsets = [0, 256], sizes = [8, 128], strides = [1, 1]} : vector<8x512xf32> to vector<8x128xf32>
    %318 = math.tanh %317 : vector<8x128xf32>
    %319 = vector.extract_strided_slice %300 {offsets = [0, 384], sizes = [8, 128], strides = [1, 1]} : vector<8x512xf32> to vector<8x128xf32>
    %cst_130 = arith.constant 5.000000e-01 : f32
    %320 = vector.broadcast %cst_130 : f32 to vector<8x128xf32>
    %321 = arith.mulf %320, %319 : vector<8x128xf32>
    %322 = math.tanh %321 : vector<8x128xf32>
    %cst_131 = arith.constant 1.000000e+00 : f32
    %323 = vector.broadcast %cst_131 : f32 to vector<8x128xf32>
    %324 = arith.addf %322, %323 : vector<8x128xf32>
    %cst_132 = arith.constant 5.000000e-01 : f32
    %325 = vector.broadcast %cst_132 : f32 to vector<8x128xf32>
    %326 = arith.mulf %325, %324 : vector<8x128xf32>
    %327 = arith.mulf %316, %289 : vector<8x128xf32>
    %328 = arith.mulf %308, %318 : vector<8x128xf32>
    %329 = arith.addf %327, %328 : vector<8x128xf32>
    %330 = math.tanh %329 : vector<8x128xf32>
    %331 = arith.mulf %326, %330 : vector<8x128xf32>
    %332 = arith.index_cast %295 : i32 to index
    %c0_133 = arith.constant 0 : index
    %333 = vector.load %arg11[%332, %c0_133] : memref<64x128xf32, #tpu.memory_space<vmem>>, vector<8x128xf32>
    tpu.vector_store %arg11[%332, %c0_133], %331 {strides = array<i32>} : memref<64x128xf32, #tpu.memory_space<vmem>>, vector<8x128xf32>,
    %c8_i32_134 = arith.constant 8 : i32
    %c0_135 = arith.constant 0 : index
    %c0_136 = arith.constant 0 : index
    %334 = vector.load %arg11[%c0_135, %c0_136] : memref<64x128xf32, #tpu.memory_space<vmem>>, vector<64x128xf32>
    %c0_137 = arith.constant 0 : index
    %c0_138 = arith.constant 0 : index
    %335 = vector.load %arg7[%c0_137, %c0_138] : memref<128x128xf32, #tpu.memory_space<vmem>>, vector<128x128xf32>
    %cst_139 = arith.constant dense<0.000000e+00> : vector<64x128xf32>
    %336 = tpu.matmul %334, %335, %cst_139 {dimension_numbers = #tpu.dot_dimension_numbers<[1], [0], [0], [1], [0, 0, 1, 1], [], []>} : vector<64x128xf32>, vector<128x128xf32>, vector<64x128xf32> -> vector<64x128xf32>
    %c0_140 = arith.constant 0 : index
    %c0_141 = arith.constant 0 : index
    %337 = vector.load %arg8[%c0_140, %c0_141] : memref<1x128xf32, #tpu.memory_space<vmem>>, vector<1x128xf32>
    %338 = vector.broadcast %337 : vector<1x128xf32> to vector<64x128xf32>
    %339 = arith.addf %336, %338 : vector<64x128xf32>
    %c0_142 = arith.constant 0 : index
    %c0_143 = arith.constant 0 : index
    %340 = vector.load %arg9[%c0_142, %c0_143] : memref<64x128xf32, #tpu.memory_space<vmem>>, vector<64x128xf32>
    tpu.vector_store %arg9[%c0_142, %c0_143], %339 {strides = array<i32>} : memref<64x128xf32, #tpu.memory_space<vmem>>, vector<64x128xf32>,
    return
  }
}

</mosaic_0001>

<bundles_post_ra>
// kernel: decoder_forward.1
= control target key start
LH: loop header
LB: loop body
LE: loop exit
PB: predicated region body
PF: predicated region fallthrough
CT: control target
= control target key end

     0   :  { %v3297_v3 = vmov 0.0   ;;  %vm70_vm0 = vcmask 130048   ;;  %v3298_v11 = vmov 0.0|0.0   ;;  %vm3299_vm1 = vmmov 0   ;;  %s4409_s2 = inlined_call_operand.vmem [shape: f32[16,512], index: 2, kind: input, shape index: {}]   ;;  %s4410_s5 = inlined_call_operand.vmem [shape: f32[32,128], index: 5, kind: input, shape index: {}]   ;;  %s4411_s0 = inlined_call_operand.vmem [shape: f32[64,16], index: 0, kind: input, shape index: {}]   ;;  %s4412_s3 = inlined_call_operand.vmem [shape: f32[128,512], index: 3, kind: input, shape index: {}]   ;;  %s4413_s1 = inlined_call_operand.vmem [shape: f32[8,32], index: 1, kind: input, shape index: {}]   ;;  %s4414_s6 = inlined_call_operand.vmem [shape: f32[1,128], index: 6, kind: input, shape index: {}]   ;;  %s4415_s4 = inlined_call_operand.vmem [shape: f32[1,512], index: 4, kind: input, shape index: {}]   ;;  %s4416_s7 = inlined_call_operand.vmem [shape: f32[128,128], index: 7, kind: input, shape index: {}]   ;;  %s4417_s8 = inlined_call_operand.vmem [shape: f32[1,128], index: 8, kind: input, shape index: {}]   ;;  %s4418_s9 = inlined_call_operand.vmem [shape: f32[64,128], index: 9, kind: output, shape index: {}]  }
   0x1   :  { %v41_v0 = vld [vmem:[%s4409_s2 + $0x8] sm:$0xff]  ;;  %v40_v2 = vld [vmem:[%s4409_s2] sm:$0xff]  ;;  %159 = vmatprep.mubr.f32.mxu0 %v3297_v3  ;;  %272 = vmatprep.mubr.f32.mxu1 %v3297_v3  ;;  %v356_v12 = vld [vmem:[%s4410_s5 + $0x10] sm:$0xff]  ;;  %vm365_vm2 = vcmask 261120  }
   0x2   :  { %v45_v1 = vld [vmem:[%s4409_s2 + $0x28] sm:$0xff]  ;;  %v44_v5 = vld [vmem:[%s4409_s2 + $0x20] sm:$0xff]  ;;  %v357_v13 = vld [vmem:[%s4410_s5 + $0x18] sm:$0xff] }
   0x3   :  { %v2592_v4 = vpack.c.bf16 %v45_v1, %v41_v0  ;;  %v354_v6 = vld [vmem:[%s4410_s5] sm:$0xff]  ;;  %v2594_v7 = vpack.c.bf16 %v44_v5, %v40_v2  ;;  %v355_v8 = vld [vmem:[%s4410_s5 + $0x8] sm:$0xff]  ;;  %v43_v14 = vld [vmem:[%s4409_s2 + $0x18] sm:$0xff]  ;;  %v2604_v24 = vpack.c.bf16 %v357_v13, %v356_v12 }
   0x4   :  { %v32_v9 = vld [vmem:[%s4411_s0] sm:$0xff]  ;;  %v2601_v10 = vpack.c.bf16 %v355_v8, %v354_v6  ;;  %v47_v15 = vld [vmem:[%s4409_s2 + $0x38] sm:$0xff]  ;;  %v42_v16 = vld [vmem:[%s4409_s2 + $0x10] sm:$0xff] }
   0x5   :  { %2593 = vmatprep.subr.bf16.mxu0 %v2592_v4  ;;  %v46_v17 = vld [vmem:[%s4409_s2 + $0x30] sm:$0xff]  ;;  %v2596_v18 = vpack.c.bf16 %v47_v15, %v43_v14  ;;  %v447_v20 = vld [vmem:[%s4412_s3 + $0x8] sm:$0xff]  ;;  %v449_v22 = vld [vmem:[%s4412_s3 + $0x18] sm:$0xff] }
   0x6   :  { %2595 = vmatpush1.bf16.msra.mxu0 %v2594_v7  ;;  %v2598_v19 = vpack.c.bf16 %v46_v17, %v42_v16  ;;  %v451_v21 = vld [vmem:[%s4412_s3 + $0x28] sm:$0xff]  ;;  %v453_v25 = vld [vmem:[%s4412_s3 + $0x38] sm:$0xff]  ;;  %v448_v28 = vld [vmem:[%s4412_s3 + $0x10] sm:$0xff] }
   0x7   :  { %2600 = vmatprep.subr.bf16.mxu0 %v3298_v11  ;;  %v33_v23 = vld [vmem:[%s4411_s0 + $0x8] sm:$0xff]  ;;  %2597 = vmatprep.subr.bf16.mxu1 %v2596_v18  ;;  %v3408_v26 = vpack.c.bf16 %v451_v21, %v447_v20  ;;  %v3410_v27 = vpack.c.bf16 %v453_v25, %v449_v22  ;;  %v452_v29 = vld [vmem:[%s4412_s3 + $0x30] sm:$0xff]  ;;  %v457_v31 = vld [vmem:[%s4412_s3 + $0x58] sm:$0xff] }
   0x8   :  { %2599 = vmatpush1.bf16.msra.mxu1 %v2598_v19  ;;  %v3418_v30 = vpack.c.bf16 %v452_v29, %v448_v28  ;;  %v461_v32 = vld [vmem:[%s4412_s3 + $0x78] sm:$0xff]  ;;  %v456_v34 = vld [vmem:[%s4412_s3 + $0x50] sm:$0xff]  ;;  %v36_v50 = vld [vmem:[%s4411_s0 + $0x20] sm:$0xff] }
   0x9   :  { %2489 = vmatmul.mubr.msk.f32.vlgmr.msra.gmra.mrb[0].mxu0 %vm70_vm0, %v32_v9  ;;  %2639 = vmatprep.subr.bf16.mxu1 %v3410_v27  ;;  %v3428_v33 = vpack.c.bf16 %v461_v32, %v457_v31  ;;  %v34_v35 = vld [vmem:[%s4411_s0 + $0x10] sm:$0xff]  ;;  %v465_v37 = vld [vmem:[%s4412_s3 + $0x98] sm:$0xff]  ;;  %v37_v57 = vld [vmem:[%s4411_s0 + $0x28] sm:$0xff] }
   0xa   :  { %2602 = vmatpush3.bf16.msra.mxu0 %v2601_v10  ;;  %165 = vmatprep.mubr.f32.mxu0 %v3297_v3  ;;  %v460_v36 = vld [vmem:[%s4412_s3 + $0x70] sm:$0xff]  ;;  %v469_v38 = vld [vmem:[%s4412_s3 + $0xb8] sm:$0xff]  ;;  %v450_v12 = vld [vmem:[%s4412_s3 + $0x20] sm:$0xff] }
   0xb   :  { %2603 = vmatprep.subr.bf16.mxu0 %v3298_v11  ;;  %2497 = vmatmul.mubr.msk.f32.vlgmr.msra.gmra.mrb[0].mxu1 %vm70_vm0, %v32_v9  ;;  %v3450_v39 = vpack.c.bf16 %v460_v36, %v456_v34  ;;  %v3454_v40 = vpack.c.bf16 %v469_v38, %v465_v37  ;;  %v464_v41 = vld [vmem:[%s4412_s3 + $0x90] sm:$0xff]  ;;  %v35_v43 = vld [vmem:[%s4411_s0 + $0x18] sm:$0xff]  ;;  %v446_v11 = vld [vmem:[%s4412_s3] sm:$0xff] }
   0xc   :  { %2641 = vmatpush1.bf16.msra.mxu1 %v3418_v30  ;;  %278 = vmatprep.mubr.f32.mxu1 %v3297_v3  ;;  %v468_v42 = vld [vmem:[%s4412_s3 + $0xb0] sm:$0xff]  ;;  %v473_v44 = vld [vmem:[%s4412_s3 + $0xd8] sm:$0xff]  ;;  %v455_v13 = vld [vmem:[%s4412_s3 + $0x48] sm:$0xff]  ;;  %v3597_v18 = vpack.c.bf16 %v450_v12, %v446_v11 }
   0xd   :  { %2490 = vmatmul.mubr.msk.f32.gmra.mrb[2].mxu0 %vm70_vm0, %v33_v23  ;;  %2643 = vmatprep.subr.bf16.mxu1 %v3428_v33  ;;  %v477_v45 = vld [vmem:[%s4412_s3 + $0xf8] sm:$0xff]  ;;  %v3475_v46 = vpack.c.bf16 %v468_v42, %v464_v41  ;;  %v472_v48 = vld [vmem:[%s4412_s3 + $0xd0] sm:$0xff]  ;;  %v459_v14 = vld [vmem:[%s4412_s3 + $0x68] sm:$0xff] }
   0xe   :  { %171 = vmatprep.mubr.f32.mxu0 %v3297_v3  ;;  %2605 = vmatpush3.bf16.msra.mxu0 %v2604_v24  ;;  %v3479_v47 = vpack.c.bf16 %v477_v45, %v473_v44  ;;  %v476_v49 = vld [vmem:[%s4412_s3 + $0xf0] sm:$0xff]  ;;  %v481_v51 = vld [vmem:[%s4412_s3 + $0x118] sm:$0xff]  ;;  %v353_v17 = vld [vmem:[%s4413_s1] sm:$0xff]  ;;  %v3599_v19 = vpack.c.bf16 %v459_v14, %v455_v13 }
   0xf   :  { %2607 = vmatprep.subr.bf16.mxu0 %v3408_v26  ;;  %2498 = vmatmul.mubr.msk.f32.gmra.mrb[2].mxu1 %vm70_vm0, %v33_v23  ;;  %v485_v52 = vld [vmem:[%s4412_s3 + $0x138] sm:$0xff]  ;;  %v3500_v53 = vpack.c.bf16 %v476_v49, %v472_v48  ;;  %v480_v55 = vld [vmem:[%s4412_s3 + $0x110] sm:$0xff]  ;;  %v454_v20 = vld [vmem:[%s4412_s3 + $0x40] sm:$0xff] }
  0x10   :  { %2645 = vmatpush1.bf16.msra.mxu1 %v3450_v39  ;;  %284 = vmatprep.mubr.f32.mxu1 %v3297_v3  ;;  %v3504_v54 = vpack.c.bf16 %v485_v52, %v481_v51  ;;  %v484_v56 = vld [vmem:[%s4412_s3 + $0x130] sm:$0xff]  ;;  %v489_v58 = vld [vmem:[%s4412_s3 + $0x158] sm:$0xff]  ;;  %v458_v21 = vld [vmem:[%s4412_s3 + $0x60] sm:$0xff] }
  0x11   :  { %2491 = vmatmul.mubr.msk.f32.gmra.mrb[4].mxu0 %vm70_vm0, %v34_v35  ;;  %2647 = vmatprep.subr.bf16.mxu1 %v3454_v40  ;;  %v493_v59 = vld [vmem:[%s4412_s3 + $0x178] sm:$0xff]  ;;  %v3525_v60 = vpack.c.bf16 %v484_v56, %v480_v55  ;;  %v488_v62 = vld [vmem:[%s4412_s3 + $0x150] sm:$0xff]  ;;  %v463_v22 = vld [vmem:[%s4412_s3 + $0x88] sm:$0xff]  ;;  %v3618_v24 = vpack.c.bf16 %v458_v21, %v454_v20  ;;  %v50_v21 = vlaneseq }
  0x12   :  { %177 = vmatprep.mubr.f32.mxu0 %v3297_v3  ;;  %v3529_v61 = vpack.c.bf16 %v493_v59, %v489_v58  ;;  %v492_v63 = vld [vmem:[%s4412_s3 + $0x170] sm:$0xff]  ;;  %v497_v1 = vld [vmem:[%s4412_s3 + $0x198] sm:$0xff]  ;;  %v467_v23 = vld [vmem:[%s4412_s3 + $0xa8] sm:$0xff] }
  0x13   :  { %2499 = vmatmul.mubr.msk.f32.gmra.mrb[4].mxu1 %vm70_vm0, %v34_v35  ;;  %v38_v0 = vld [vmem:[%s4411_s0 + $0x30] sm:$0xff]  ;;  %v501_v2 = vld [vmem:[%s4412_s3 + $0x1b8] sm:$0xff]  ;;  %v3550_v4 = vpack.c.bf16 %v492_v63, %v488_v62  ;;  %v3622_v25 = vpack.c.bf16 %v467_v23, %v463_v22  ;;  %v462_v28 = vld [vmem:[%s4412_s3 + $0x80] sm:$0xff]  ;;  %v51_v22 = vshrl.u32 %v50_v21, 7 }
  0x14   :  { %2649 = vmatpush1.bf16.msra.mxu1 %v3475_v46  ;;  %290 = vmatprep.mubr.f32.mxu1 %v3297_v3  ;;  %v3554_v5 = vpack.c.bf16 %v501_v2, %v497_v1  ;;  %v496_v6 = vld [vmem:[%s4412_s3 + $0x190] sm:$0xff]  ;;  %v39_v8 = vld [vmem:[%s4411_s0 + $0x38] sm:$0xff]  ;;  %v466_v29 = vld [vmem:[%s4412_s3 + $0xa0] sm:$0xff] }
  0x15   :  { %2492 = vmatmul.mubr.msk.f32.gmra.mrb[6].mxu0 %vm70_vm0, %v35_v43  ;;  %2651 = vmatprep.subr.bf16.mxu1 %v3479_v47  ;;  %v500_v7 = vld [vmem:[%s4412_s3 + $0x1b0] sm:$0xff]  ;;  %v505_v9 = vld [vmem:[%s4412_s3 + $0x1d8] sm:$0xff]  ;;  %v471_v31 = vld [vmem:[%s4412_s3 + $0xc8] sm:$0xff]  ;;  %v3639_v34 = vpack.c.bf16 %v466_v29, %v462_v28  ;;  %v52_v23 = vsub.s32 0, %v51_v22  ;;  %v56_v29 = vsub.s32 1, %v51_v22 }
  0x16   :  { %183 = vmatprep.mubr.f32.mxu0 %v3297_v3  ;;  %v509_v10 = vld [vmem:[%s4412_s3 + $0x1f8] sm:$0xff]  ;;  %v3587_v15 = vpack.c.bf16 %v500_v7, %v496_v6  ;;  %v475_v32 = vld [vmem:[%s4412_s3 + $0xe8] sm:$0xff]  ;;  %v470_v36 = vld [vmem:[%s4412_s3 + $0xc0] sm:$0xff] }
  0x17   :  { %2500 = vmatmul.mubr.msk.f32.gmra.mrb[6].mxu1 %vm70_vm0, %v35_v43  ;;  %v3591_v16 = vpack.c.bf16 %v509_v10, %v505_v9  ;;  %v3642_v35 = vpack.c.bf16 %v475_v32, %v471_v31  ;;  %v474_v37 = vld [vmem:[%s4412_s3 + $0xe0] sm:$0xff]  ;;  %v479_v38 = vld [vmem:[%s4412_s3 + $0x108] sm:$0xff]  ;;  %v504_v9 = vld [vmem:[%s4412_s3 + $0x1d0] sm:$0xff]  ;;  %v60_v32 = vsub.s32 2, %v51_v22 }
  0x18   :  { %2653 = vmatpush1.bf16.msra.mxu1 %v3500_v53  ;;  %296 = vmatprep.mubr.f32.mxu1 %v3297_v3  ;;  %v483_v41 = vld [vmem:[%s4412_s3 + $0x128] sm:$0xff]  ;;  %v3657_v42 = vpack.c.bf16 %v474_v37, %v470_v36  ;;  %v478_v44 = vld [vmem:[%s4412_s3 + $0x100] sm:$0xff]  ;;  %v508_v11 = vld [vmem:[%s4412_s3 + $0x1f0] sm:$0xff] }
  0x19   :  { %2493 = vmatmul.mubr.msk.f32.gmra.mrb[8].mxu0 %vm70_vm0, %v36_v50  ;;  %2655 = vmatprep.subr.bf16.mxu1 %v3504_v54  ;;  %v3660_v43 = vpack.c.bf16 %v483_v41, %v479_v38  ;;  %v482_v45 = vld [vmem:[%s4412_s3 + $0x120] sm:$0xff]  ;;  %v487_v48 = vld [vmem:[%s4412_s3 + $0x148] sm:$0xff]  ;;  %v3732_v12 = vpack.c.bf16 %v508_v11, %v504_v9 }
  0x1a   :  { %189 = vmatprep.mubr.f32.mxu0 %v3297_v3  ;;  %v491_v49 = vld [vmem:[%s4412_s3 + $0x168] sm:$0xff]  ;;  %v486_v52 = vld [vmem:[%s4412_s3 + $0x140] sm:$0xff] }
  0x1b   :  { %2501 = vmatmul.mubr.msk.f32.gmra.mrb[8].mxu1 %vm70_vm0, %v36_v50  ;;  %v3675_v50 = vpack.c.bf16 %v482_v45, %v478_v44  ;;  %v3678_v51 = vpack.c.bf16 %v491_v49, %v487_v48  ;;  %v490_v55 = vld [vmem:[%s4412_s3 + $0x160] sm:$0xff]  ;;  %v495_v56 = vld [vmem:[%s4412_s3 + $0x188] sm:$0xff]  ;;  %v64_v48 = vsub.s32 3, %v51_v22 }
  0x1c   :  { %2657 = vmatpush1.bf16.msra.mxu1 %v3525_v60  ;;  %302 = vmatprep.mubr.f32.mxu1 %v3297_v3  ;;  %v3693_v58 = vpack.c.bf16 %v490_v55, %v486_v52  ;;  %v494_v62 = vld [vmem:[%s4412_s3 + $0x180] sm:$0xff]  ;;  %v507_v1 = vld [vmem:[%s4412_s3 + $0x1e8] sm:$0xff] }
  0x1d   :  { %2494 = vmatmul.mubr.msk.f32.gmra.mrb[10].mxu0 %vm70_vm0, %v37_v57  ;;  %2659 = vmatprep.subr.bf16.mxu1 %v3529_v61  ;;  %v498_v63 = vld [vmem:[%s4412_s3 + $0x1a0] sm:$0xff] }
  0x1e   :  { %195 = vmatprep.mubr.f32.mxu0 %v3297_v3  ;;  %v3711_v2 = vpack.c.bf16 %v498_v63, %v494_v62  ;;  %v502_v7 = vld [vmem:[%s4412_s3 + $0x1c0] sm:$0xff] }
  0x1f   :  { %2502 = vmatmul.mubr.msk.f32.gmra.mrb[10].mxu1 %vm70_vm0, %v37_v57  ;;  %v499_v57 = vld [vmem:[%s4412_s3 + $0x1a8] sm:$0xff]  ;;  %v2505_v13 = vld [vmem:[%s4414_s6] ss:$0 sm:$0xff] }
  0x20   :  { %2661 = vmatpush1.bf16.msra.mxu1 %v3550_v4  ;;  %308 = vmatprep.mubr.f32.mxu1 %v3297_v3  ;;  %v3696_v59 = vpack.c.bf16 %v499_v57, %v495_v56  ;;  %v48_v28 = vld [vmem:[%s4415_s4] sm:$0xf] }
  0x21   :  { %2495 = vmatmul.mubr.msk.f32.gmra.mrb[12].mxu0 %vm70_vm0, %v38_v0  ;;  %2663 = vmatprep.subr.bf16.mxu1 %v3554_v5  ;;  %v3778_v31 = vrot.slane %v48_v28, %v52_v23  ;;  %v3780_v36 = vrot.slane %v48_v28, %v56_v29  ;;  %v3783_v44 = vrot.slane %v48_v28, %v60_v32 }
  0x22   :  { %201 = vmatprep.mubr.f32.mxu0 %v3297_v3  ;;  %v3787_v62 = vrot.slane %v48_v28, %v64_v48 }
  0x23   :  { %2503 = vmatmul.mubr.msk.f32.gmra.mrb[12].mxu1 %vm70_vm0, %v38_v0  ;;  %v503_v0 = vld [vmem:[%s4412_s3 + $0x1c8] sm:$0xff] }
  0x24   :  { %2665 = vmatpush1.bf16.msra.mxu1 %v3587_v15  ;;  %314 = vmatprep.mubr.f32.mxu1 %v3297_v3  ;;  %v3714_v6 = vpack.c.bf16 %v507_v1, %v503_v0 }
  0x25   :  { %2496 = vmatmul.mubr.msk.f32.gmra.mrb[14].mxu0 %vm70_vm0, %v39_v8  ;;  %2667 = vmatprep.subr.bf16.mxu1 %v3591_v16 }
  0x26   :  { %2545 = vmatprep.mubr.msk.f32.mxu0 %vm3299_vm1, %v3297_v3 }
  0x27   :  { %2504 = vmatmul.mubr.msk.f32.gmra.mrb[14].mxu1 %vm70_vm0, %v39_v8  ;;  %v506_v8 = vld [vmem:[%s4412_s3 + $0x1e0] sm:$0xff] }
  0x28   :  { %645 = vmatprep.mubr.f32.mxu1 %v3297_v3  ;;  %v3727_v10 = vpack.c.bf16 %v506_v8, %v502_v7  ;;  %2669 = vmatpush1.bf16.msra.mxu1 %v3732_v12 }
  0x29   :  { %2546 = vmatmul.mubr.msk.f32.vlgmr.msra.gmra.mrb[16].mxu0 %vm365_vm2, %v353_v17  ;;  %2703 = vmatprep.subr.bf16.mxu1 %v3410_v27 }
  0x2a   :  { %2609 = vmatpush1.bf16.msra.mxu0 %v3597_v18  ;;  %574 = vmatprep.mubr.f32.mxu0 %v3297_v3 }
  0x2b   :  { %2611 = vmatprep.subr.bf16.mxu0 %v3599_v19 }
  0x2e   :  { %2613 = vmatpush1.bf16.msra.mxu0 %v3618_v24 }
  0x2f   :  { %2615 = vmatprep.subr.bf16.mxu0 %v3622_v25 }
  0x32   :  { %2617 = vmatpush1.bf16.msra.mxu0 %v3639_v34 }
  0x33   :  { %2619 = vmatprep.subr.bf16.mxu0 %v3642_v35 }
  0x36   :  { %2621 = vmatpush1.bf16.msra.mxu0 %v3657_v42 }
  0x37   :  { %2623 = vmatprep.subr.bf16.mxu0 %v3660_v43 }
  0x3a   :  { %2625 = vmatpush1.bf16.msra.mxu0 %v3675_v50 }
  0x3b   :  { %2627 = vmatprep.subr.bf16.mxu0 %v3678_v51 }
  0x3e   :  { %2629 = vmatpush1.bf16.msra.mxu0 %v3693_v58 }
  0x3f   :  { %2631 = vmatprep.subr.bf16.mxu0 %v3696_v59 }
  0x42   :  { %2633 = vmatpush1.bf16.msra.mxu0 %v3711_v2 }
  0x43   :  { %2635 = vmatprep.subr.bf16.mxu0 %v3714_v6 }
  0x46   :  { %2637 = vmatpush1.bf16.msra.mxu0 %v3727_v10 }
  0x47   :  { %2671 = vmatprep.subr.bf16.mxu0 %v3408_v26 }
  0xfc   :  { %v435_v14 = vpop.f32.mrb[16].mxu0 }
  0xfd   :  { %v436_v17 = vadd.f32 %v2505_v13, %v435_v14  ;;  %v2547_v20 = vpop.f32.mrb[17].mxu0 }
  0xff   :  { %575 = vmatmul.mubr.f32.vlgmr.msra.gmra.mrb[0].mxu0 %v436_v17  ;;  %646 = vmatmul.mubr.f32.vlgmr.msra.gmra.mrb[0].mxu1 %v436_v17 }
 0x100   :  { %2673 = vmatpush1.bf16.msra.mxu0 %v3597_v18  ;;  %2705 = vmatpush1.bf16.msra.mxu1 %v3418_v30 }
 0x101   :  { %2675 = vmatprep.subr.bf16.mxu0 %v3599_v19  ;;  %2707 = vmatprep.subr.bf16.mxu1 %v3428_v33 }
 0x102   :  { %810 = vmatprep.mubr.f32.mxu0 %v3297_v3  ;;  %881 = vmatprep.mubr.f32.mxu1 %v3297_v3 }
 0x104   :  { %2677 = vmatpush1.bf16.msra.mxu0 %v3618_v24  ;;  %2709 = vmatpush1.bf16.msra.mxu1 %v3450_v39 }
 0x105   :  { %2679 = vmatprep.subr.bf16.mxu0 %v3622_v25  ;;  %2711 = vmatprep.subr.bf16.mxu1 %v3454_v40 }
 0x108   :  { %2681 = vmatpush1.bf16.msra.mxu0 %v3639_v34  ;;  %2713 = vmatpush1.bf16.msra.mxu1 %v3475_v46 }
 0x109   :  { %2683 = vmatprep.subr.bf16.mxu0 %v3642_v35  ;;  %2715 = vmatprep.subr.bf16.mxu1 %v3479_v47 }
 0x10c   :  { %2685 = vmatpush1.bf16.msra.mxu0 %v3657_v42  ;;  %2717 = vmatpush1.bf16.msra.mxu1 %v3500_v53 }
 0x10d   :  { %2687 = vmatprep.subr.bf16.mxu0 %v3660_v43  ;;  %2719 = vmatprep.subr.bf16.mxu1 %v3504_v54 }
 0x110   :  { %2689 = vmatpush1.bf16.msra.mxu0 %v3675_v50  ;;  %2721 = vmatpush1.bf16.msra.mxu1 %v3525_v60 }
 0x111   :  { %2691 = vmatprep.subr.bf16.mxu0 %v3678_v51  ;;  %2723 = vmatprep.subr.bf16.mxu1 %v3529_v61 }
 0x114   :  { %2693 = vmatpush1.bf16.msra.mxu0 %v3693_v58  ;;  %2725 = vmatpush1.bf16.msra.mxu1 %v3550_v4 }
 0x115   :  { %2695 = vmatprep.subr.bf16.mxu0 %v3696_v59  ;;  %2727 = vmatprep.subr.bf16.mxu1 %v3554_v5 }
 0x118   :  { %2697 = vmatpush1.bf16.msra.mxu0 %v3711_v2  ;;  %2729 = vmatpush1.bf16.msra.mxu1 %v3587_v15 }
 0x119   :  { %2699 = vmatprep.subr.bf16.mxu0 %v3714_v6  ;;  %2731 = vmatprep.subr.bf16.mxu1 %v3591_v16 }
 0x11c   :  { %2701 = vmatpush1.bf16.msra.mxu0 %v3727_v10  ;;  %2733 = vmatpush1.bf16.msra.mxu1 %v3732_v12 }
 0x11d   :  { %2735 = vmatprep.subr.bf16.mxu0 %v3408_v26  ;;  %2767 = vmatprep.subr.bf16.mxu1 %v3410_v27 }
 0x1d2   :  { %v576_v37 = vpop.f32.mrb[0].mxu0  ;;  %v647_v38 = vpop.f32.mrb[0].mxu1 }
 0x1d3   :  { %v3150_v41 = vadd.f32 %v576_v37, %v3778_v31  ;;  %v578_v45 = vpop.f32.mrb[1].mxu0  ;;  %v649_v49 = vpop.f32.mrb[1].mxu1  ;;  %v3166_v57 = vadd.f32 %v647_v38, %v3783_v44 }
 0x1d4   :  { %v3151_v52 = vadd.f32 %v578_v45, %v3780_v36  ;;  %v3167_v63 = vadd.f32 %v649_v49, %v3787_v62 }
 0x1d5   :  { %v656_v55 = vmul.f32 0.5, %v3150_v41 }
 0x1d6   :  { %v660_v56 = vmul.f32 0.5, %v3151_v52  ;;  %v665_v0 = vmul.f32 0.5, %v3167_v63 }
 0x1d7   :  { %3217 = vtanh.f32 %v656_v55 }
 0x1d8   :  { %3219 = vtanh.f32 %v660_v56 }
 0x1d9   :  { %3221 = vtanh.f32 %v3166_v57 }
 0x1da   :  { %3223 = vtanh.f32 %v665_v0 }
 0x1e1   :  { %v3218_v1 = vpop.eup %3217 }
 0x1e2   :  { %v3220_v7 = vpop.eup %3219  ;;  %v658_v8 = vadd.f32 1.0, %v3218_v1 }
 0x1e3   :  { %v662_v9 = vadd.f32 1.0, %v3220_v7  ;;  %v3222_v13 = vpop.eup %3221 }
 0x1e4   :  { %v659_v11 = vmul.f32 0.5, %v658_v8  ;;  %v3224_v22 = vpop.eup %3223 }
 0x1e5   :  { %v663_v14 = vmul.f32 0.5, %v662_v9  ;;  %v667_v23 = vadd.f32 1.0, %v3224_v22 }
 0x1e6   :  { %v670_v17 = vmul.f32 %v3222_v13, %v659_v11 }
 0x1e7   :  { %v669_v20 = vmul.f32 0.0, %v663_v14  ;;  %v668_v28 = vmul.f32 0.5, %v667_v23 }
 0x1e9   :  { %v3790_v21 = vadd.f32 %v670_v17, %v669_v20 }
 0x1eb   :  { %3225 = vtanh.f32 %v3790_v21 }
 0x1f5   :  { %v3226_v29 = vpop.eup %3225 }
 0x1f6   :  { %v3793_v32 = vmul.f32 %v3226_v29, %v668_v28  ;;  %v1393_v29 = vld [vmem:[%s4412_s3] sm:$0xff] }
 0x1f8   :  { %811 = vmatmul.mubr.f32.vlgmr.msra.gmra.mrb[2].mxu0 %v3793_v32  ;;  %882 = vmatmul.mubr.f32.vlgmr.msra.gmra.mrb[2].mxu1 %v3793_v32 }
 0x1f9   :  { %2737 = vmatpush1.bf16.msra.mxu0 %v3597_v18  ;;  %2769 = vmatpush1.bf16.msra.mxu1 %v3418_v30 }
 0x1fa   :  { %2739 = vmatprep.subr.bf16.mxu0 %v3599_v19  ;;  %2771 = vmatprep.subr.bf16.mxu1 %v3428_v33 }
 0x1fb   :  { %1047 = vmatprep.mubr.f32.mxu0 %v3297_v3  ;;  %1118 = vmatprep.mubr.f32.mxu1 %v3297_v3 }
 0x1fd   :  { %2741 = vmatpush1.bf16.msra.mxu0 %v3618_v24  ;;  %2773 = vmatpush1.bf16.msra.mxu1 %v3450_v39 }
 0x1fe   :  { %2743 = vmatprep.subr.bf16.mxu0 %v3622_v25  ;;  %2775 = vmatprep.subr.bf16.mxu1 %v3454_v40 }
 0x201   :  { %2745 = vmatpush1.bf16.msra.mxu0 %v3639_v34  ;;  %2777 = vmatpush1.bf16.msra.mxu1 %v3475_v46 }
 0x202   :  { %2747 = vmatprep.subr.bf16.mxu0 %v3642_v35  ;;  %2779 = vmatprep.subr.bf16.mxu1 %v3479_v47 }
 0x205   :  { %2749 = vmatpush1.bf16.msra.mxu0 %v3657_v42  ;;  %2781 = vmatpush1.bf16.msra.mxu1 %v3500_v53 }
 0x206   :  { %2751 = vmatprep.subr.bf16.mxu0 %v3660_v43  ;;  %2783 = vmatprep.subr.bf16.mxu1 %v3504_v54 }
 0x209   :  { %2753 = vmatpush1.bf16.msra.mxu0 %v3675_v50  ;;  %2785 = vmatpush1.bf16.msra.mxu1 %v3525_v60 }
 0x20a   :  { %2755 = vmatprep.subr.bf16.mxu0 %v3678_v51  ;;  %2787 = vmatprep.subr.bf16.mxu1 %v3529_v61 }
 0x20d   :  { %2757 = vmatpush1.bf16.msra.mxu0 %v3693_v58  ;;  %2789 = vmatpush1.bf16.msra.mxu1 %v3550_v4 }
 0x20e   :  { %2759 = vmatprep.subr.bf16.mxu0 %v3696_v59  ;;  %2791 = vmatprep.subr.bf16.mxu1 %v3554_v5 }
 0x211   :  { %2761 = vmatpush1.bf16.msra.mxu0 %v3711_v2  ;;  %2793 = vmatpush1.bf16.msra.mxu1 %v3587_v15 }
 0x212   :  { %2763 = vmatprep.subr.bf16.mxu0 %v3714_v6  ;;  %2795 = vmatprep.subr.bf16.mxu1 %v3591_v16 }
 0x215   :  { %2765 = vmatpush1.bf16.msra.mxu0 %v3727_v10  ;;  %2797 = vmatpush1.bf16.msra.mxu1 %v3732_v12 }
 0x216   :  { %2799 = vmatprep.subr.bf16.mxu0 %v3408_v26  ;;  %2831 = vmatprep.subr.bf16.mxu1 %v3410_v27 }
 0x2cb   :  { %v812_v37 = vpop.f32.mrb[2].mxu0  ;;  %v883_v38 = vpop.f32.mrb[2].mxu1 }
 0x2cc   :  { %v3152_v41 = vadd.f32 %v812_v37, %v3778_v31  ;;  %v814_v45 = vpop.f32.mrb[3].mxu0  ;;  %v885_v48 = vpop.f32.mrb[3].mxu1  ;;  %v3168_v56 = vadd.f32 %v883_v38, %v3783_v44  ;;  %v1397_v37 = vld [vmem:[%s4412_s3 + $0x20] sm:$0xff] }
 0x2cd   :  { %v3153_v49 = vadd.f32 %v814_v45, %v3780_v36  ;;  %v3169_v57 = vadd.f32 %v885_v48, %v3787_v62  ;;  %v1395_v45 = vld [vmem:[%s4412_s3 + $0x10] sm:$0xff] }
 0x2ce   :  { %v892_v52 = vmul.f32 0.5, %v3152_v41  ;;  %v3911_v41 = vpack.c.bf16 %v1397_v37, %v1393_v29  ;;  %v1399_v48 = vld [vmem:[%s4412_s3 + $0x30] sm:$0xff]  ;;  %v1434_v37 = vld [vmem:[%s4412_s3 + $0x148] sm:$0xff] }
 0x2cf   :  { %v896_v55 = vmul.f32 0.5, %v3153_v49  ;;  %v901_v26 = vmul.f32 0.5, %v3169_v57  ;;  %v3920_v49 = vpack.c.bf16 %v1399_v48, %v1395_v45  ;;  %v1438_v45 = vld [vmem:[%s4412_s3 + $0x168] sm:$0xff]  ;;  %v1436_v48 = vld [vmem:[%s4412_s3 + $0x158] sm:$0xff] }
 0x2d0   :  { %3227 = vtanh.f32 %v892_v52  ;;  %v1402_v52 = vld [vmem:[%s4412_s3 + $0x48] sm:$0xff] }
 0x2d1   :  { %3229 = vtanh.f32 %v896_v55  ;;  %v1406_v55 = vld [vmem:[%s4412_s3 + $0x68] sm:$0xff] }
 0x2d2   :  { %3231 = vtanh.f32 %v3168_v56  ;;  %v1404_v56 = vld [vmem:[%s4412_s3 + $0x58] sm:$0xff]  ;;  %v3934_v57 = vpack.c.bf16 %v1406_v55, %v1402_v52  ;;  %v4078_v52 = vpack.c.bf16 %v1438_v45, %v1434_v37 }
 0x2d3   :  { %3233 = vtanh.f32 %v901_v26  ;;  %v1408_v26 = vld [vmem:[%s4412_s3 + $0x78] sm:$0xff] }
 0x2d4   :  { %v1440_v55 = vld [vmem:[%s4412_s3 + $0x178] sm:$0xff] }
 0x2da   :  { %v3228_v63 = vpop.eup %3227 }
 0x2db   :  { %v3230_v27 = vpop.eup %3229  ;;  %v894_v0 = vadd.f32 1.0, %v3228_v63  ;;  %v1401_v63 = vld [vmem:[%s4412_s3 + $0x40] sm:$0xff] }
 0x2dc   :  { %v898_v1 = vadd.f32 1.0, %v3230_v27  ;;  %v3232_v8 = vpop.eup %3231  ;;  %v1405_v27 = vld [vmem:[%s4412_s3 + $0x60] sm:$0xff] }
 0x2dd   :  { %v895_v7 = vmul.f32 0.5, %v894_v0  ;;  %v3234_v17 = vpop.eup %3233  ;;  %v3945_v0 = vpack.c.bf16 %v1408_v26, %v1404_v56  ;;  %v1433_v56 = vld [vmem:[%s4412_s3 + $0x140] sm:$0xff] }
 0x2de   :  { %v899_v9 = vmul.f32 0.5, %v898_v1  ;;  %v903_v20 = vadd.f32 1.0, %v3234_v17  ;;  %v3947_v1 = vpack.c.bf16 %v1405_v27, %v1401_v63  ;;  %v1437_v26 = vld [vmem:[%s4412_s3 + $0x160] sm:$0xff]  ;;  %v4089_v63 = vpack.c.bf16 %v1440_v55, %v1436_v48 }
 0x2df   :  { %v906_v11 = vmul.f32 %v3232_v8, %v895_v7  ;;  %v1403_v7 = vld [vmem:[%s4412_s3 + $0x50] sm:$0xff]  ;;  %v4091_v27 = vpack.c.bf16 %v1437_v26, %v1433_v56 }
 0x2e0   :  { %v905_v13 = vmul.f32 %v899_v9, %v3790_v21  ;;  %v904_v22 = vmul.f32 0.5, %v903_v20  ;;  %v1400_v21 = vld [vmem:[%s4412_s3 + $0x38] sm:$0xff]  ;;  %v1407_v8 = vld [vmem:[%s4412_s3 + $0x70] sm:$0xff] }
 0x2e1   :  { %v3956_v9 = vpack.c.bf16 %v1407_v8, %v1403_v7  ;;  %v1416_v20 = vld [vmem:[%s4412_s3 + $0xb8] sm:$0xff]  ;;  %v1435_v7 = vld [vmem:[%s4412_s3 + $0x150] sm:$0xff] }
 0x2e2   :  { %v3836_v14 = vadd.f32 %v906_v11, %v905_v13  ;;  %v1410_v11 = vld [vmem:[%s4412_s3 + $0x88] sm:$0xff]  ;;  %v1439_v8 = vld [vmem:[%s4412_s3 + $0x170] sm:$0xff] }
 0x2e3   :  { %v1414_v13 = vld [vmem:[%s4412_s3 + $0xa8] sm:$0xff] }
 0x2e4   :  { %3235 = vtanh.f32 %v3836_v14  ;;  %v3970_v17 = vpack.c.bf16 %v1414_v13, %v1410_v11  ;;  %v4100_v11 = vpack.c.bf16 %v1439_v8, %v1435_v7  ;;  %v1442_v13 = vld [vmem:[%s4412_s3 + $0x188] sm:$0xff] }
 0x2ee   :  { %v3236_v23 = vpop.eup %3235 }
 0x2ef   :  { %v3839_v28 = vmul.f32 %v3236_v23, %v904_v22  ;;  %v1409_v22 = vld [vmem:[%s4412_s3 + $0x80] sm:$0xff] }
 0x2f0   :  { %v1413_v23 = vld [vmem:[%s4412_s3 + $0xa0] sm:$0xff] }
 0x2f1   :  { %1048 = vmatmul.mubr.f32.vlgmr.msra.gmra.mrb[4].mxu0 %v3839_v28  ;;  %1119 = vmatmul.mubr.f32.vlgmr.msra.gmra.mrb[4].mxu1 %v3839_v28 }
 0x2f2   :  { %2801 = vmatpush1.bf16.msra.mxu0 %v3597_v18  ;;  %2833 = vmatpush1.bf16.msra.mxu1 %v3418_v30 }
 0x2f3   :  { %2803 = vmatprep.subr.bf16.mxu0 %v3599_v19  ;;  %2835 = vmatprep.subr.bf16.mxu1 %v3428_v33 }
 0x2f4   :  { %1284 = vmatprep.mubr.f32.mxu0 %v3297_v3  ;;  %1355 = vmatprep.mubr.f32.mxu1 %v3297_v3 }
 0x2f6   :  { %2805 = vmatpush1.bf16.msra.mxu0 %v3618_v24  ;;  %2837 = vmatpush1.bf16.msra.mxu1 %v3450_v39 }
 0x2f7   :  { %2807 = vmatprep.subr.bf16.mxu0 %v3622_v25  ;;  %2839 = vmatprep.subr.bf16.mxu1 %v3454_v40 }
 0x2fa   :  { %2809 = vmatpush1.bf16.msra.mxu0 %v3639_v34  ;;  %2841 = vmatpush1.bf16.msra.mxu1 %v3475_v46 }
 0x2fb   :  { %2811 = vmatprep.subr.bf16.mxu0 %v3642_v35  ;;  %2843 = vmatprep.subr.bf16.mxu1 %v3479_v47 }
 0x2fe   :  { %2813 = vmatpush1.bf16.msra.mxu0 %v3657_v42  ;;  %2845 = vmatpush1.bf16.msra.mxu1 %v3500_v53 }
 0x2ff   :  { %2815 = vmatprep.subr.bf16.mxu0 %v3660_v43  ;;  %2847 = vmatprep.subr.bf16.mxu1 %v3504_v54 }
 0x302   :  { %2817 = vmatpush1.bf16.msra.mxu0 %v3675_v50  ;;  %2849 = vmatpush1.bf16.msra.mxu1 %v3525_v60 }
 0x303   :  { %2819 = vmatprep.subr.bf16.mxu0 %v3678_v51  ;;  %2851 = vmatprep.subr.bf16.mxu1 %v3529_v61 }
 0x306   :  { %2821 = vmatpush1.bf16.msra.mxu0 %v3693_v58  ;;  %2853 = vmatpush1.bf16.msra.mxu1 %v3550_v4 }
 0x307   :  { %2823 = vmatprep.subr.bf16.mxu0 %v3696_v59  ;;  %2855 = vmatprep.subr.bf16.mxu1 %v3554_v5 }
 0x30a   :  { %2825 = vmatpush1.bf16.msra.mxu0 %v3711_v2  ;;  %2857 = vmatpush1.bf16.msra.mxu1 %v3587_v15  ;;  %v1394_v2 = vld [vmem:[%s4412_s3 + $0x8] sm:$0xff] }
 0x30b   :  { %2827 = vmatprep.subr.bf16.mxu0 %v3714_v6  ;;  %2859 = vmatprep.subr.bf16.mxu1 %v3591_v16  ;;  %v1398_v6 = vld [vmem:[%s4412_s3 + $0x28] sm:$0xff] }
 0x30e   :  { %2829 = vmatpush1.bf16.msra.mxu0 %v3727_v10  ;;  %2861 = vmatpush1.bf16.msra.mxu1 %v3732_v12  ;;  %v1396_v10 = vld [vmem:[%s4412_s3 + $0x18] sm:$0xff]  ;;  %v3898_v12 = vpack.c.bf16 %v1398_v6, %v1394_v2 }
 0x30f   :  { %v3909_v38 = vpack.c.bf16 %v1400_v21, %v1396_v10  ;;  %v1427_v10 = vld [vmem:[%s4412_s3 + $0x110] sm:$0xff] }
 0x310   :  { %2863 = vmatprep.subr.bf16.mxu0 %v3898_v12  ;;  %v1431_v21 = vld [vmem:[%s4412_s3 + $0x130] sm:$0xff] }
 0x311   :  { %2895 = vmatprep.subr.bf16.mxu1 %v3909_v38  ;;  %v4064_v29 = vpack.c.bf16 %v1431_v21, %v1427_v10  ;;  %v1451_v10 = vld [vmem:[%s4412_s3 + $0x1d0] sm:$0xff] }
 0x312   :  { %v1455_v21 = vld [vmem:[%s4412_s3 + $0x1f0] sm:$0xff] }
 0x313   :  { %v4172_v37 = vpack.c.bf16 %v1455_v21, %v1451_v10 }
 0x3c4   :  { %v1049_v30 = vpop.f32.mrb[4].mxu0  ;;  %v1120_v33 = vpop.f32.mrb[4].mxu1 }
 0x3c5   :  { %v3154_v39 = vadd.f32 %v1049_v30, %v3778_v31  ;;  %v1051_v40 = vpop.f32.mrb[5].mxu0  ;;  %v1122_v46 = vpop.f32.mrb[5].mxu1  ;;  %v3170_v60 = vadd.f32 %v1120_v33, %v3783_v44  ;;  %v3983_v33 = vpack.c.bf16 %v1413_v23, %v1409_v22  ;;  %v1448_v23 = vld [vmem:[%s4412_s3 + $0x1b8] sm:$0xff] }
 0x3c6   :  { %v3155_v47 = vadd.f32 %v1051_v40, %v3780_v36  ;;  %v3171_v61 = vadd.f32 %v1122_v46, %v3787_v62  ;;  %v1415_v40 = vld [vmem:[%s4412_s3 + $0xb0] sm:$0xff] }
 0x3c7   :  { %v1129_v53 = vmul.f32 0.5, %v3154_v39  ;;  %v1411_v39 = vld [vmem:[%s4412_s3 + $0x90] sm:$0xff] }
 0x3c8   :  { %v1133_v54 = vmul.f32 0.5, %v3155_v47  ;;  %v1138_v4 = vmul.f32 0.5, %v3171_v61  ;;  %v3992_v46 = vpack.c.bf16 %v1415_v40, %v1411_v39  ;;  %v1418_v47 = vld [vmem:[%s4412_s3 + $0xc8] sm:$0xff]  ;;  %v1424_v61 = vld [vmem:[%s4412_s3 + $0xf8] sm:$0xff]  ;;  %v1441_v39 = vld [vmem:[%s4412_s3 + $0x180] sm:$0xff] }
 0x3c9   :  { %3237 = vtanh.f32 %v1129_v53  ;;  %v1422_v53 = vld [vmem:[%s4412_s3 + $0xe8] sm:$0xff]  ;;  %v1445_v40 = vld [vmem:[%s4412_s3 + $0x1a0] sm:$0xff] }
 0x3ca   :  { %3239 = vtanh.f32 %v1133_v54  ;;  %v1420_v54 = vld [vmem:[%s4412_s3 + $0xd8] sm:$0xff] }
 0x3cb   :  { %3241 = vtanh.f32 %v3170_v60  ;;  %v4006_v60 = vpack.c.bf16 %v1422_v53, %v1418_v47  ;;  %v4127_v53 = vpack.c.bf16 %v1445_v40, %v1441_v39 }
 0x3cc   :  { %3243 = vtanh.f32 %v1138_v4  ;;  %v1417_v4 = vld [vmem:[%s4412_s3 + $0xc0] sm:$0xff] }
 0x3d3   :  { %v3238_v5 = vpop.eup %3237 }
 0x3d4   :  { %v3240_v15 = vpop.eup %3239  ;;  %v1131_v16 = vadd.f32 1.0, %v3238_v5  ;;  %v1421_v5 = vld [vmem:[%s4412_s3 + $0xe0] sm:$0xff] }
 0x3d5   :  { %v1135_v18 = vadd.f32 1.0, %v3240_v15  ;;  %v3242_v24 = vpop.eup %3241  ;;  %v4017_v15 = vpack.c.bf16 %v1424_v61, %v1420_v54  ;;  %v1443_v54 = vld [vmem:[%s4412_s3 + $0x190] sm:$0xff] }
 0x3d6   :  { %v1132_v19 = vmul.f32 0.5, %v1131_v16  ;;  %v3244_v43 = vpop.eup %3243  ;;  %v4019_v16 = vpack.c.bf16 %v1421_v5, %v1417_v4  ;;  %v1447_v61 = vld [vmem:[%s4412_s3 + $0x1b0] sm:$0xff]  ;;  %v1450_v5 = vld [vmem:[%s4412_s3 + $0x1c8] sm:$0xff] }
 0x3d7   :  { %v1136_v25 = vmul.f32 0.5, %v1135_v18  ;;  %v1140_v50 = vadd.f32 1.0, %v3244_v43  ;;  %v1419_v18 = vld [vmem:[%s4412_s3 + $0xd0] sm:$0xff]  ;;  %v4136_v4 = vpack.c.bf16 %v1447_v61, %v1443_v54 }
 0x3d8   :  { %v1143_v34 = vmul.f32 %v3242_v24, %v1132_v19  ;;  %v1423_v19 = vld [vmem:[%s4412_s3 + $0xf0] sm:$0xff] }
 0x3d9   :  { %v1142_v35 = vmul.f32 %v1136_v25, %v3836_v14  ;;  %v1141_v51 = vmul.f32 0.5, %v1140_v50  ;;  %v1412_v14 = vld [vmem:[%s4412_s3 + $0x98] sm:$0xff]  ;;  %v4028_v24 = vpack.c.bf16 %v1423_v19, %v1419_v18  ;;  %v1426_v25 = vld [vmem:[%s4412_s3 + $0x108] sm:$0xff] }
 0x3da   :  { %v3981_v30 = vpack.c.bf16 %v1416_v20, %v1412_v14  ;;  %v1432_v50 = vld [vmem:[%s4412_s3 + $0x138] sm:$0xff]  ;;  %v1446_v14 = vld [vmem:[%s4412_s3 + $0x1a8] sm:$0xff] }
 0x3db   :  { %v3880_v42 = vadd.f32 %v1143_v34, %v1142_v35  ;;  %v1430_v34 = vld [vmem:[%s4412_s3 + $0x128] sm:$0xff]  ;;  %v1428_v35 = vld [vmem:[%s4412_s3 + $0x118] sm:$0xff]  ;;  %v4114_v22 = vpack.c.bf16 %v1446_v14, %v1442_v13 }
 0x3dc   :  { %v4042_v43 = vpack.c.bf16 %v1430_v34, %v1426_v25  ;;  %v4053_v2 = vpack.c.bf16 %v1432_v50, %v1428_v35  ;;  %v1444_v20 = vld [vmem:[%s4412_s3 + $0x198] sm:$0xff]  ;;  %v1454_v18 = vld [vmem:[%s4412_s3 + $0x1e8] sm:$0xff]  ;;  %v1449_v35 = vld [vmem:[%s4412_s3 + $0x1c0] sm:$0xff] }
 0x3dd   :  { %3245 = vtanh.f32 %v3880_v42  ;;  %v4125_v47 = vpack.c.bf16 %v1448_v23, %v1444_v20  ;;  %v1452_v19 = vld [vmem:[%s4412_s3 + $0x1d8] sm:$0xff]  ;;  %v4150_v25 = vpack.c.bf16 %v1454_v18, %v1450_v5  ;;  %v1453_v50 = vld [vmem:[%s4412_s3 + $0x1e0] sm:$0xff] }
 0x3de   :  { %v1456_v34 = vld [vmem:[%s4412_s3 + $0x1f8] sm:$0xff] }
 0x3e7   :  { %v3246_v58 = vpop.eup %3245 }
 0x3e8   :  { %v3883_v59 = vmul.f32 %v3246_v58, %v1141_v51  ;;  %v1425_v51 = vld [vmem:[%s4412_s3 + $0x100] sm:$0xff] }
 0x3e9   :  { %v1429_v58 = vld [vmem:[%s4412_s3 + $0x120] sm:$0xff] }
 0x3ea   :  { %1285 = vmatmul.mubr.f32.vlgmr.msra.gmra.mrb[6].mxu0 %v3883_v59  ;;  %1356 = vmatmul.mubr.f32.vlgmr.msra.gmra.mrb[6].mxu1 %v3883_v59  ;;  %v4055_v6 = vpack.c.bf16 %v1429_v58, %v1425_v51  ;;  %v4161_v51 = vpack.c.bf16 %v1456_v34, %v1452_v19  ;;  %v4163_v58 = vpack.c.bf16 %v1453_v50, %v1449_v35 }
 0x3eb   :  { %1521 = vmatprep.mubr.f32.mxu0 %v3297_v3  ;;  %1592 = vmatprep.mubr.f32.mxu1 %v3297_v3 }
 0x3ec   :  { %2865 = vmatpush1.bf16.msra.mxu0 %v3911_v41  ;;  %2897 = vmatpush1.bf16.msra.mxu1 %v3920_v49 }
 0x3ed   :  { %2867 = vmatprep.subr.bf16.mxu0 %v3934_v57  ;;  %2899 = vmatprep.subr.bf16.mxu1 %v3945_v0 }
 0x3f0   :  { %2869 = vmatpush1.bf16.msra.mxu0 %v3947_v1  ;;  %2901 = vmatpush1.bf16.msra.mxu1 %v3956_v9 }
 0x3f1   :  { %2871 = vmatprep.subr.bf16.mxu0 %v3970_v17  ;;  %2903 = vmatprep.subr.bf16.mxu1 %v3981_v30 }
 0x3f4   :  { %2873 = vmatpush1.bf16.msra.mxu0 %v3983_v33  ;;  %2905 = vmatpush1.bf16.msra.mxu1 %v3992_v46 }
 0x3f5   :  { %2875 = vmatprep.subr.bf16.mxu0 %v4006_v60  ;;  %2907 = vmatprep.subr.bf16.mxu1 %v4017_v15 }
 0x3f8   :  { %2877 = vmatpush1.bf16.msra.mxu0 %v4019_v16  ;;  %2909 = vmatpush1.bf16.msra.mxu1 %v4028_v24 }
 0x3f9   :  { %2879 = vmatprep.subr.bf16.mxu0 %v4042_v43  ;;  %2911 = vmatprep.subr.bf16.mxu1 %v4053_v2 }
 0x3fc   :  { %2881 = vmatpush1.bf16.msra.mxu0 %v4055_v6  ;;  %2913 = vmatpush1.bf16.msra.mxu1 %v4064_v29 }
 0x3fd   :  { %2883 = vmatprep.subr.bf16.mxu0 %v4078_v52  ;;  %2915 = vmatprep.subr.bf16.mxu1 %v4089_v63 }
 0x400   :  { %2885 = vmatpush1.bf16.msra.mxu0 %v4091_v27  ;;  %2917 = vmatpush1.bf16.msra.mxu1 %v4100_v11 }
 0x401   :  { %2887 = vmatprep.subr.bf16.mxu0 %v4114_v22  ;;  %2919 = vmatprep.subr.bf16.mxu1 %v4125_v47 }
 0x404   :  { %2889 = vmatpush1.bf16.msra.mxu0 %v4127_v53  ;;  %2921 = vmatpush1.bf16.msra.mxu1 %v4136_v4 }
 0x405   :  { %2891 = vmatprep.subr.bf16.mxu0 %v4150_v25  ;;  %2923 = vmatprep.subr.bf16.mxu1 %v4161_v51 }
 0x408   :  { %2893 = vmatpush1.bf16.msra.mxu0 %v4163_v58  ;;  %2925 = vmatpush1.bf16.msra.mxu1 %v4172_v37 }
 0x409   :  { %2927 = vmatprep.subr.bf16.mxu0 %v3898_v12  ;;  %2959 = vmatprep.subr.bf16.mxu1 %v3909_v38 }
 0x4bd   :  { %v1286_v45 = vpop.f32.mrb[6].mxu0  ;;  %v1357_v48 = vpop.f32.mrb[6].mxu1 }
 0x4be   :  { %v3156_v55 = vadd.f32 %v1286_v45, %v3778_v31  ;;  %v1288_v56 = vpop.f32.mrb[7].mxu0  ;;  %v1359_v26 = vpop.f32.mrb[7].mxu1  ;;  %v3172_v14 = vadd.f32 %v1357_v48, %v3783_v44 }
 0x4bf   :  { %v3157_v7 = vadd.f32 %v1288_v56, %v3780_v36  ;;  %v3173_v20 = vadd.f32 %v1359_v26, %v3787_v62 }
 0x4c0   :  { %v1366_v8 = vmul.f32 0.5, %v3156_v55 }
 0x4c1   :  { %v1370_v13 = vmul.f32 0.5, %v3157_v7  ;;  %v1375_v23 = vmul.f32 0.5, %v3173_v20 }
 0x4c2   :  { %3247 = vtanh.f32 %v1366_v8 }
 0x4c3   :  { %3249 = vtanh.f32 %v1370_v13 }
 0x4c4   :  { %3251 = vtanh.f32 %v3172_v14 }
 0x4c5   :  { %3253 = vtanh.f32 %v1375_v23 }
 0x4cc   :  { %v3248_v39 = vpop.eup %3247 }
 0x4cd   :  { %v3250_v40 = vpop.eup %3249  ;;  %v1368_v54 = vadd.f32 1.0, %v3248_v39 }
 0x4ce   :  { %v1372_v61 = vadd.f32 1.0, %v3250_v40  ;;  %v3252_v18 = vpop.eup %3251 }
 0x4cf   :  { %v1369_v5 = vmul.f32 0.5, %v1368_v54  ;;  %v3254_v10 = vpop.eup %3253 }
 0x4d0   :  { %v1373_v19 = vmul.f32 0.5, %v1372_v61  ;;  %v1377_v21 = vadd.f32 1.0, %v3254_v10 }
 0x4d1   :  { %v1380_v34 = vmul.f32 %v3252_v18, %v1369_v5 }
 0x4d2   :  { %v1379_v35 = vmul.f32 %v1373_v19, %v3880_v42  ;;  %v1378_v45 = vmul.f32 0.5, %v1377_v21 }
 0x4d4   :  { %v4184_v50 = vadd.f32 %v1380_v34, %v1379_v35 }
 0x4d6   :  { %3255 = vtanh.f32 %v4184_v50 }
 0x4e0   :  { %v3256_v48 = vpop.eup %3255 }
 0x4e1   :  { %v4187_v55 = vmul.f32 %v3256_v48, %v1378_v45 }
 0x4e3   :  { %1522 = vmatmul.mubr.f32.vlgmr.msra.gmra.mrb[8].mxu0 %v4187_v55  ;;  %1593 = vmatmul.mubr.f32.vlgmr.msra.gmra.mrb[8].mxu1 %v4187_v55 }
 0x4e4   :  { %2929 = vmatpush1.bf16.msra.mxu0 %v3911_v41  ;;  %2961 = vmatpush1.bf16.msra.mxu1 %v3920_v49 }
 0x4e5   :  { %2931 = vmatprep.subr.bf16.mxu0 %v3934_v57  ;;  %2963 = vmatprep.subr.bf16.mxu1 %v3945_v0 }
 0x4e6   :  { %1758 = vmatprep.mubr.f32.mxu0 %v3297_v3  ;;  %1829 = vmatprep.mubr.f32.mxu1 %v3297_v3 }
 0x4e8   :  { %2933 = vmatpush1.bf16.msra.mxu0 %v3947_v1  ;;  %2965 = vmatpush1.bf16.msra.mxu1 %v3956_v9 }
 0x4e9   :  { %2935 = vmatprep.subr.bf16.mxu0 %v3970_v17  ;;  %2967 = vmatprep.subr.bf16.mxu1 %v3981_v30 }
 0x4ec   :  { %2937 = vmatpush1.bf16.msra.mxu0 %v3983_v33  ;;  %2969 = vmatpush1.bf16.msra.mxu1 %v3992_v46 }
 0x4ed   :  { %2939 = vmatprep.subr.bf16.mxu0 %v4006_v60  ;;  %2971 = vmatprep.subr.bf16.mxu1 %v4017_v15 }
 0x4f0   :  { %2941 = vmatpush1.bf16.msra.mxu0 %v4019_v16  ;;  %2973 = vmatpush1.bf16.msra.mxu1 %v4028_v24 }
 0x4f1   :  { %2943 = vmatprep.subr.bf16.mxu0 %v4042_v43  ;;  %2975 = vmatprep.subr.bf16.mxu1 %v4053_v2 }
 0x4f4   :  { %2945 = vmatpush1.bf16.msra.mxu0 %v4055_v6  ;;  %2977 = vmatpush1.bf16.msra.mxu1 %v4064_v29 }
 0x4f5   :  { %2947 = vmatprep.subr.bf16.mxu0 %v4078_v52  ;;  %2979 = vmatprep.subr.bf16.mxu1 %v4089_v63 }
 0x4f8   :  { %2949 = vmatpush1.bf16.msra.mxu0 %v4091_v27  ;;  %2981 = vmatpush1.bf16.msra.mxu1 %v4100_v11 }
 0x4f9   :  { %2951 = vmatprep.subr.bf16.mxu0 %v4114_v22  ;;  %2983 = vmatprep.subr.bf16.mxu1 %v4125_v47 }
 0x4fc   :  { %2953 = vmatpush1.bf16.msra.mxu0 %v4127_v53  ;;  %2985 = vmatpush1.bf16.msra.mxu1 %v4136_v4 }
 0x4fd   :  { %2955 = vmatprep.subr.bf16.mxu0 %v4150_v25  ;;  %2987 = vmatprep.subr.bf16.mxu1 %v4161_v51 }
 0x500   :  { %2957 = vmatpush1.bf16.msra.mxu0 %v4163_v58  ;;  %2989 = vmatpush1.bf16.msra.mxu1 %v4172_v37 }
 0x501   :  { %2991 = vmatprep.subr.bf16.mxu0 %v3898_v12  ;;  %3023 = vmatprep.subr.bf16.mxu1 %v3909_v38 }
 0x5b6   :  { %v1523_v42 = vpop.f32.mrb[8].mxu0  ;;  %v1594_v56 = vpop.f32.mrb[8].mxu1 }
 0x5b7   :  { %v3158_v26 = vadd.f32 %v1523_v42, %v3778_v31  ;;  %v1525_v7 = vpop.f32.mrb[9].mxu0  ;;  %v1596_v8 = vpop.f32.mrb[9].mxu1  ;;  %v3174_v23 = vadd.f32 %v1594_v56, %v3783_v44 }
 0x5b8   :  { %v3159_v13 = vadd.f32 %v1525_v7, %v3780_v36  ;;  %v3175_v39 = vadd.f32 %v1596_v8, %v3787_v62 }
 0x5b9   :  { %v1603_v14 = vmul.f32 0.5, %v3158_v26 }
 0x5ba   :  { %v1607_v20 = vmul.f32 0.5, %v3159_v13  ;;  %v1612_v40 = vmul.f32 0.5, %v3175_v39 }
 0x5bb   :  { %3257 = vtanh.f32 %v1603_v14 }
 0x5bc   :  { %3259 = vtanh.f32 %v1607_v20 }
 0x5bd   :  { %3261 = vtanh.f32 %v3174_v23 }
 0x5be   :  { %3263 = vtanh.f32 %v1612_v40 }
 0x5c5   :  { %v3258_v54 = vpop.eup %3257 }
 0x5c6   :  { %v3260_v61 = vpop.eup %3259  ;;  %v1605_v5 = vadd.f32 1.0, %v3258_v54 }
 0x5c7   :  { %v1609_v18 = vadd.f32 1.0, %v3260_v61  ;;  %v3262_v34 = vpop.eup %3261 }
 0x5c8   :  { %v1606_v19 = vmul.f32 0.5, %v1605_v5  ;;  %v3264_v48 = vpop.eup %3263 }
 0x5c9   :  { %v1610_v35 = vmul.f32 0.5, %v1609_v18  ;;  %v1614_v42 = vadd.f32 1.0, %v3264_v48 }
 0x5ca   :  { %v1617_v10 = vmul.f32 %v3262_v34, %v1606_v19 }
 0x5cb   :  { %v1616_v21 = vmul.f32 %v1610_v35, %v4184_v50  ;;  %v1615_v56 = vmul.f32 0.5, %v1614_v42 }
 0x5cd   :  { %v4230_v45 = vadd.f32 %v1617_v10, %v1616_v21 }
 0x5cf   :  { %3265 = vtanh.f32 %v4230_v45 }
 0x5d9   :  { %v3266_v26 = vpop.eup %3265 }
 0x5da   :  { %v4233_v7 = vmul.f32 %v3266_v26, %v1615_v56 }
 0x5dc   :  { %1759 = vmatmul.mubr.f32.vlgmr.msra.gmra.mrb[10].mxu0 %v4233_v7  ;;  %1830 = vmatmul.mubr.f32.vlgmr.msra.gmra.mrb[10].mxu1 %v4233_v7 }
 0x5dd   :  { %2993 = vmatpush1.bf16.msra.mxu0 %v3911_v41  ;;  %3025 = vmatpush1.bf16.msra.mxu1 %v3920_v49 }
 0x5de   :  { %2995 = vmatprep.subr.bf16.mxu0 %v3934_v57  ;;  %3027 = vmatprep.subr.bf16.mxu1 %v3945_v0 }
 0x5df   :  { %1995 = vmatprep.mubr.f32.mxu0 %v3297_v3  ;;  %2066 = vmatprep.mubr.f32.mxu1 %v3297_v3 }
 0x5e1   :  { %2997 = vmatpush1.bf16.msra.mxu0 %v3947_v1  ;;  %3029 = vmatpush1.bf16.msra.mxu1 %v3956_v9 }
 0x5e2   :  { %2999 = vmatprep.subr.bf16.mxu0 %v3970_v17  ;;  %3031 = vmatprep.subr.bf16.mxu1 %v3981_v30 }
 0x5e5   :  { %3001 = vmatpush1.bf16.msra.mxu0 %v3983_v33  ;;  %3033 = vmatpush1.bf16.msra.mxu1 %v3992_v46 }
 0x5e6   :  { %3003 = vmatprep.subr.bf16.mxu0 %v4006_v60  ;;  %3035 = vmatprep.subr.bf16.mxu1 %v4017_v15 }
 0x5e9   :  { %3005 = vmatpush1.bf16.msra.mxu0 %v4019_v16  ;;  %3037 = vmatpush1.bf16.msra.mxu1 %v4028_v24 }
 0x5ea   :  { %3007 = vmatprep.subr.bf16.mxu0 %v4042_v43  ;;  %3039 = vmatprep.subr.bf16.mxu1 %v4053_v2 }
 0x5ed   :  { %3009 = vmatpush1.bf16.msra.mxu0 %v4055_v6  ;;  %3041 = vmatpush1.bf16.msra.mxu1 %v4064_v29 }
 0x5ee   :  { %3011 = vmatprep.subr.bf16.mxu0 %v4078_v52  ;;  %3043 = vmatprep.subr.bf16.mxu1 %v4089_v63 }
 0x5f1   :  { %3013 = vmatpush1.bf16.msra.mxu0 %v4091_v27  ;;  %3045 = vmatpush1.bf16.msra.mxu1 %v4100_v11 }
 0x5f2   :  { %3015 = vmatprep.subr.bf16.mxu0 %v4114_v22  ;;  %3047 = vmatprep.subr.bf16.mxu1 %v4125_v47 }
 0x5f5   :  { %3017 = vmatpush1.bf16.msra.mxu0 %v4127_v53  ;;  %3049 = vmatpush1.bf16.msra.mxu1 %v4136_v4 }
 0x5f6   :  { %3019 = vmatprep.subr.bf16.mxu0 %v4150_v25  ;;  %3051 = vmatprep.subr.bf16.mxu1 %v4161_v51 }
 0x5f9   :  { %3021 = vmatpush1.bf16.msra.mxu0 %v4163_v58  ;;  %3053 = vmatpush1.bf16.msra.mxu1 %v4172_v37 }
 0x5fa   :  { %3087 = vmatprep.subr.bf16.mxu1 %v3909_v38  ;;  %3055 = vmatprep.subr.bf16.mxu0 %v3898_v12 }
 0x6af   :  { %v1760_v50 = vpop.f32.mrb[10].mxu0  ;;  %v1831_v8 = vpop.f32.mrb[10].mxu1 }
 0x6b0   :  { %v3160_v13 = vadd.f32 %v1760_v50, %v3778_v31  ;;  %v1762_v14 = vpop.f32.mrb[11].mxu0  ;;  %v1833_v20 = vpop.f32.mrb[11].mxu1  ;;  %v3176_v54 = vadd.f32 %v1831_v8, %v3783_v44 }
 0x6b1   :  { %v3161_v23 = vadd.f32 %v1762_v14, %v3780_v36  ;;  %v3177_v61 = vadd.f32 %v1833_v20, %v3787_v62  ;;  %v2346_v14 = vld [vmem:[%s4416_s7 + $0x20] sm:$0xff]  ;;  %v2347_v20 = vld [vmem:[%s4416_s7 + $0x28] sm:$0xff] }
 0x6b2   :  { %v1840_v39 = vmul.f32 0.5, %v3160_v13 }
 0x6b3   :  { %v1844_v40 = vmul.f32 0.5, %v3161_v23  ;;  %v1849_v38 = vmul.f32 0.5, %v3177_v61  ;;  %v3126_v23 = vpack.c.bf16 %v2347_v20, %v2346_v14  ;;  %v2350_v61 = vld [vmem:[%s4416_s7 + $0x40] sm:$0xff] }
 0x6b4   :  { %3267 = vtanh.f32 %v1840_v39  ;;  %v2348_v39 = vld [vmem:[%s4416_s7 + $0x30] sm:$0xff] }
 0x6b5   :  { %3269 = vtanh.f32 %v1844_v40  ;;  %v2349_v40 = vld [vmem:[%s4416_s7 + $0x38] sm:$0xff] }
 0x6b6   :  { %3271 = vtanh.f32 %v3176_v54  ;;  %v3130_v54 = vpack.c.bf16 %v2349_v40, %v2348_v39 }
 0x6b7   :  { %3273 = vtanh.f32 %v1849_v38 }
 0x6be   :  { %v3268_v5 = vpop.eup %3267 }
 0x6bf   :  { %v3270_v12 = vpop.eup %3269  ;;  %v1842_v18 = vadd.f32 1.0, %v3268_v5  ;;  %v2352_v5 = vld [vmem:[%s4416_s7 + $0x50] sm:$0xff] }
 0x6c0   :  { %v1846_v19 = vadd.f32 1.0, %v3270_v12  ;;  %v3272_v35 = vpop.eup %3271  ;;  %v2353_v12 = vld [vmem:[%s4416_s7 + $0x58] sm:$0xff] }
 0x6c1   :  { %v1843_v34 = vmul.f32 0.5, %v1842_v18  ;;  %v3274_v56 = vpop.eup %3273  ;;  %v3138_v18 = vpack.c.bf16 %v2353_v12, %v2352_v5 }
 0x6c2   :  { %v1847_v10 = vmul.f32 0.5, %v1846_v19  ;;  %v1851_v26 = vadd.f32 1.0, %v3274_v56  ;;  %v2354_v19 = vld [vmem:[%s4416_s7 + $0x60] sm:$0xff] }
 0x6c3   :  { %v1854_v21 = vmul.f32 %v3272_v35, %v1843_v34  ;;  %v2355_v34 = vld [vmem:[%s4416_s7 + $0x68] sm:$0xff] }
 0x6c4   :  { %v1853_v48 = vmul.f32 %v1847_v10, %v4230_v45  ;;  %v1852_v50 = vmul.f32 0.5, %v1851_v26  ;;  %v3142_v35 = vpack.c.bf16 %v2355_v34, %v2354_v19  ;;  %v2356_v10 = vld [vmem:[%s4416_s7 + $0x70] sm:$0xff] }
 0x6c6   :  { %v4276_v42 = vadd.f32 %v1854_v21, %v1853_v48  ;;  %v2357_v21 = vld [vmem:[%s4416_s7 + $0x78] sm:$0xff] }
 0x6c7   :  { %v3146_v48 = vpack.c.bf16 %v2357_v21, %v2356_v10 }
 0x6c8   :  { %3275 = vtanh.f32 %v4276_v42 }
 0x6d2   :  { %v3276_v8 = vpop.eup %3275 }
 0x6d3   :  { %v4279_v13 = vmul.f32 %v3276_v8, %v1852_v50 }
 0x6d5   :  { %1996 = vmatmul.mubr.f32.vlgmr.msra.gmra.mrb[12].mxu0 %v4279_v13  ;;  %2067 = vmatmul.mubr.f32.vlgmr.msra.gmra.mrb[12].mxu1 %v4279_v13 }
 0x6d6   :  { %3089 = vmatpush1.bf16.msra.mxu1 %v3920_v49  ;;  %3057 = vmatpush1.bf16.msra.mxu0 %v3911_v41  ;;  %v2343_v41 = vld [vmem:[%s4416_s7 + $0x8] sm:$0xff] }
 0x6d7   :  { %3091 = vmatprep.subr.bf16.mxu1 %v3945_v0  ;;  %3059 = vmatprep.subr.bf16.mxu0 %v3934_v57 }
 0x6d8   :  { %2232 = vmatprep.mubr.f32.mxu0 %v3297_v3  ;;  %2303 = vmatprep.mubr.f32.mxu1 %v3297_v3  ;;  %v2342_v3 = vld [vmem:[%s4416_s7] sm:$0xff] }
 0x6d9   :  { %v3118_v49 = vpack.c.bf16 %v2343_v41, %v2342_v3 }
 0x6da   :  { %3093 = vmatpush1.bf16.msra.mxu1 %v3956_v9  ;;  %3061 = vmatpush1.bf16.msra.mxu0 %v3947_v1 }
 0x6db   :  { %3095 = vmatprep.subr.bf16.mxu1 %v3981_v30  ;;  %3063 = vmatprep.subr.bf16.mxu0 %v3970_v17 }
 0x6de   :  { %3097 = vmatpush1.bf16.msra.mxu1 %v3992_v46  ;;  %3065 = vmatpush1.bf16.msra.mxu0 %v3983_v33 }
 0x6df   :  { %3099 = vmatprep.subr.bf16.mxu1 %v4017_v15  ;;  %3067 = vmatprep.subr.bf16.mxu0 %v4006_v60 }
 0x6e2   :  { %3101 = vmatpush1.bf16.msra.mxu1 %v4028_v24  ;;  %3069 = vmatpush1.bf16.msra.mxu0 %v4019_v16 }
 0x6e3   :  { %3103 = vmatprep.subr.bf16.mxu1 %v4053_v2  ;;  %3071 = vmatprep.subr.bf16.mxu0 %v4042_v43 }
 0x6e6   :  { %3105 = vmatpush1.bf16.msra.mxu1 %v4064_v29  ;;  %3073 = vmatpush1.bf16.msra.mxu0 %v4055_v6 }
 0x6e7   :  { %3107 = vmatprep.subr.bf16.mxu1 %v4089_v63  ;;  %3075 = vmatprep.subr.bf16.mxu0 %v4078_v52 }
 0x6ea   :  { %3109 = vmatpush1.bf16.msra.mxu1 %v4100_v11  ;;  %3077 = vmatpush1.bf16.msra.mxu0 %v4091_v27 }
 0x6eb   :  { %3111 = vmatprep.subr.bf16.mxu1 %v4125_v47  ;;  %3079 = vmatprep.subr.bf16.mxu0 %v4114_v22 }
 0x6ee   :  { %3113 = vmatpush1.bf16.msra.mxu1 %v4136_v4  ;;  %3081 = vmatpush1.bf16.msra.mxu0 %v4127_v53  ;;  %v2344_v4 = vld [vmem:[%s4416_s7 + $0x10] sm:$0xff] }
 0x6ef   :  { %3115 = vmatprep.subr.bf16.mxu1 %v4161_v51  ;;  %3083 = vmatprep.subr.bf16.mxu0 %v4150_v25  ;;  %v2345_v25 = vld [vmem:[%s4416_s7 + $0x18] sm:$0xff] }
 0x6f0   :  { %v3122_v45 = vpack.c.bf16 %v2345_v25, %v2344_v4 }
 0x6f2   :  { %3117 = vmatpush1.bf16.msra.mxu1 %v4172_v37  ;;  %3085 = vmatpush1.bf16.msra.mxu0 %v4163_v58 }
 0x6f3   :  { %3119 = vmatprep.subr.bf16.mxu1 %v3118_v49 }
 0x7a8   :  { %v1997_v57 = vpop.f32.mrb[12].mxu0  ;;  %v2068_v0 = vpop.f32.mrb[12].mxu1 }
 0x7a9   :  { %v3162_v1 = vadd.f32 %v1997_v57, %v3778_v31  ;;  %v1999_v9 = vpop.f32.mrb[13].mxu0  ;;  %v2070_v17 = vpop.f32.mrb[13].mxu1  ;;  %v3178_v60 = vadd.f32 %v2068_v0, %v3783_v44 }
 0x7aa   :  { %v3163_v30 = vadd.f32 %v1999_v9, %v3780_v36  ;;  %v3179_v15 = vadd.f32 %v2070_v17, %v3787_v62 }
 0x7ab   :  { %v2077_v33 = vmul.f32 0.5, %v3162_v1 }
 0x7ac   :  { %v2081_v46 = vmul.f32 0.5, %v3163_v30  ;;  %v2086_v16 = vmul.f32 0.5, %v3179_v15 }
 0x7ad   :  { %3277 = vtanh.f32 %v2077_v33 }
 0x7ae   :  { %3279 = vtanh.f32 %v2081_v46 }
 0x7af   :  { %3281 = vtanh.f32 %v3178_v60 }
 0x7b0   :  { %3283 = vtanh.f32 %v2086_v16 }
 0x7b7   :  { %v3278_v24 = vpop.eup %3277 }
 0x7b8   :  { %v3280_v43 = vpop.eup %3279  ;;  %v2079_v2 = vadd.f32 1.0, %v3278_v24 }
 0x7b9   :  { %v2083_v6 = vadd.f32 1.0, %v3280_v43  ;;  %v3282_v52 = vpop.eup %3281 }
 0x7ba   :  { %v2080_v29 = vmul.f32 0.5, %v2079_v2  ;;  %v3284_v47 = vpop.eup %3283 }
 0x7bb   :  { %v2084_v63 = vmul.f32 0.5, %v2083_v6  ;;  %v2088_v53 = vadd.f32 1.0, %v3284_v47 }
 0x7bc   :  { %v2091_v27 = vmul.f32 %v3282_v52, %v2080_v29 }
 0x7bd   :  { %v2090_v11 = vmul.f32 %v2084_v63, %v4276_v42  ;;  %v2089_v51 = vmul.f32 0.5, %v2088_v53 }
 0x7bf   :  { %v4326_v22 = vadd.f32 %v2091_v27, %v2090_v11 }
 0x7c1   :  { %3285 = vtanh.f32 %v4326_v22 }
 0x7cb   :  { %v3286_v58 = vpop.eup %3285 }
 0x7cc   :  { %v2094_v37 = vmul.f32 %v3286_v58, %v2089_v51 }
 0x7ce   :  { %2233 = vmatmul.mubr.f32.vlgmr.msra.gmra.mrb[14].mxu0 %v2094_v37  ;;  %2304 = vmatmul.mubr.f32.vlgmr.msra.gmra.mrb[14].mxu1 %v2094_v37 }
 0x7cf   :  { %3121 = vmatpush3.bf16.msra.mxu1 %v3118_v49  ;;  %2580 = vmatprep.mubr.f32.mxu1 %v3793_v32  ;;  %v2351_v32 = vld [vmem:[%s4416_s7 + $0x48] sm:$0xff] }
 0x7d0   :  { %3123 = vmatprep.subr.bf16.mxu1 %v3122_v45  ;;  %v3134_v38 = vpack.c.bf16 %v2351_v32, %v2350_v61 }
 0x7d3   :  { %3125 = vmatpush3.bf16.msra.mxu1 %v3122_v45 }
 0x7d4   :  { %3127 = vmatprep.subr.bf16.mxu1 %v3126_v23 }
 0x7d7   :  { %3129 = vmatpush3.bf16.msra.mxu1 %v3126_v23 }
 0x7d8   :  { %3131 = vmatprep.subr.bf16.mxu1 %v3130_v54 }
 0x7db   :  { %3133 = vmatpush3.bf16.msra.mxu1 %v3130_v54 }
 0x7dc   :  { %3135 = vmatprep.subr.bf16.mxu1 %v3134_v38 }
 0x7df   :  { %3137 = vmatpush3.bf16.msra.mxu1 %v3134_v38 }
 0x7e0   :  { %3139 = vmatprep.subr.bf16.mxu1 %v3138_v18 }
 0x7e3   :  { %3141 = vmatpush3.bf16.msra.mxu1 %v3138_v18 }
 0x7e4   :  { %3143 = vmatprep.subr.bf16.mxu1 %v3142_v35 }
 0x7e7   :  { %3145 = vmatpush3.bf16.msra.mxu1 %v3142_v35 }
 0x7e8   :  { %3147 = vmatprep.subr.bf16.mxu1 %v3146_v48 }
 0x7eb   :  { %3149 = vmatpush3.bf16.msra.mxu1 %v3146_v48 }
 0x7ee   :  { %2581 = vmatmul.mubr.f32.vlgmr.msra.gmra.mrb[16].mxu1 %v3839_v28 }
 0x7ef   :  { %2583 = vmatprep.mubr.f32.mxu1 %v3883_v59 }
 0x7f2   :  { %2584 = vmatmul.mubr.f32.gmra.mrb[18].mxu1 %v4187_v55 }
 0x7f3   :  { %2586 = vmatprep.mubr.f32.mxu1 %v4233_v7 }
 0x7f6   :  { %2587 = vmatmul.mubr.f32.gmra.mrb[20].mxu1 %v4279_v13 }
 0x7f7   :  { %2589 = vmatprep.mubr.f32.mxu1 %v2094_v37 }
 0x8a1   :  { %v2234_v42 = vpop.f32.mrb[14].mxu0  ;;  %v2305_v56 = vpop.f32.mrb[14].mxu1 }
 0x8a2   :  { %v3164_v26 = vadd.f32 %v2234_v42, %v3778_v31  ;;  %v2236_v50 = vpop.f32.mrb[15].mxu0  ;;  %v2307_v8 = vpop.f32.mrb[15].mxu1  ;;  %v3180_v28 = vadd.f32 %v2305_v56, %v3783_v44 }
 0x8a3   :  { %v3165_v3 = vadd.f32 %v2236_v50, %v3780_v36  ;;  %v3181_v59 = vadd.f32 %v2307_v8, %v3787_v62  ;;  %v2507_v62 = vld [vmem:[%s4417_s8] ss:$0 sm:$0xff] }
 0x8a4   :  { %v2314_v41 = vmul.f32 0.5, %v3164_v26 }
 0x8a5   :  { %v2318_v49 = vmul.f32 0.5, %v3165_v3  ;;  %v2323_v55 = vmul.f32 0.5, %v3181_v59 }
 0x8a6   :  { %3287 = vtanh.f32 %v2314_v41 }
 0x8a7   :  { %3289 = vtanh.f32 %v2318_v49 }
 0x8a8   :  { %3291 = vtanh.f32 %v3180_v28 }
 0x8a9   :  { %3293 = vtanh.f32 %v2323_v55 }
 0x8b0   :  { %v3288_v7 = vpop.eup %3287 }
 0x8b1   :  { %v3290_v13 = vpop.eup %3289  ;;  %v2316_v57 = vadd.f32 1.0, %v3288_v7 }
 0x8b2   :  { %v2320_v0 = vadd.f32 1.0, %v3290_v13  ;;  %v3292_v1 = vpop.eup %3291 }
 0x8b3   :  { %v2317_v31 = vmul.f32 0.5, %v2316_v57  ;;  %v3294_v33 = vpop.eup %3293 }
 0x8b4   :  { %v2321_v9 = vmul.f32 0.5, %v2320_v0  ;;  %v2325_v44 = vadd.f32 1.0, %v3294_v33 }
 0x8b5   :  { %v2328_v17 = vmul.f32 %v3292_v1, %v2317_v31 }
 0x8b6   :  { %v2327_v36 = vmul.f32 %v2321_v9, %v4326_v22  ;;  %v2326_v16 = vmul.f32 0.5, %v2325_v44 }
 0x8b8   :  { %v2329_v30 = vadd.f32 %v2328_v17, %v2327_v36 }
 0x8ba   :  { %3295 = vtanh.f32 %v2329_v30 }
 0x8c1   :  { %v2582_v46 = vpop.f32.mrb[16].mxu1 }
 0x8c2   :  { %v2437_v60 = vadd.f32 %v2582_v46, %v2507_v62  ;;  %v2431_v15 = vpop.f32.mrb[17].mxu1 }
 0x8c3   :  { %v2432_v24 = vadd.f32 %v2507_v62, %v2431_v15 }
 0x8c4   :  { %v3296_v43 = vpop.eup %3295  ;;  %2471 = vst [vmem:[%s4418_s9 + $0x8] sm:$0xff] %v2437_v60 }
 0x8c5   :  { %2470 = vst [vmem:[%s4418_s9] sm:$0xff] %v2432_v24  ;;  %v2585_v2 = vpop.f32.mrb[18].mxu1  ;;  %v2331_v6 = vmul.f32 %v3296_v43, %v2326_v16 }
 0x8c6   :  { %v2447_v29 = vadd.f32 %v2585_v2, %v2507_v62  ;;  %v2441_v52 = vpop.f32.mrb[19].mxu1 }
 0x8c7   :  { %v2442_v63 = vadd.f32 %v2507_v62, %v2441_v52  ;;  %2590 = vmatmul.mubr.f32.gmra.mrb[22].mxu1 %v2331_v6 }
 0x8c8   :  { %2473 = vst [vmem:[%s4418_s9 + $0x18] sm:$0xff] %v2447_v29 }
 0x8c9   :  { %2472 = vst [vmem:[%s4418_s9 + $0x10] sm:$0xff] %v2442_v63  ;;  %v2588_v27 = vpop.f32.mrb[20].mxu1 }
 0x8ca   :  { %v2457_v11 = vadd.f32 %v2588_v27, %v2507_v62  ;;  %v2451_v22 = vpop.f32.mrb[21].mxu1 }
 0x8cb   :  { %v2452_v47 = vadd.f32 %v2507_v62, %v2451_v22 }
 0x8cc   :  { %2475 = vst [vmem:[%s4418_s9 + $0x28] sm:$0xff] %v2457_v11 }
 0x8cd   :  { %2474 = vst [vmem:[%s4418_s9 + $0x20] sm:$0xff] %v2452_v47 }
 0x99a   :  { %v2591_v53 = vpop.f32.mrb[22].mxu1 }
 0x99b   :  { %v2467_v4 = vadd.f32 %v2591_v53, %v2507_v62  ;;  %v2461_v25 = vpop.f32.mrb[23].mxu1 }
 0x99c   :  { %v2462_v51 = vadd.f32 %v2507_v62, %v2461_v25 }
 0x99d   :  { %2477 = vst [vmem:[%s4418_s9 + $0x38] sm:$0xff] %v2467_v4 }
 0x99e   :  { %2476 = vst [vmem:[%s4418_s9 + $0x30] sm:$0xff] %v2462_v51 }

</bundles_post_ra>
